<compile_context>
chip_gen: v5e
topology: v5e:2x2
jax: 0.10.0
libtpu: 0.0.40
codegen_flags: <defaults>
</compile_context>

<pallas_src>
import functools

import jax
import jax.numpy as jnp
from jax.experimental import pallas as pl
from jax.experimental.pallas import tpu as pltpu

COMPUTE_DTYPE = jnp.bfloat16   # MXU operand dtype (accumulation is always f32)
STATE_DTYPE = jnp.float32      # h/c state, gate math, logits


def _round_up(x, m):
    return ((x + m - 1) // m) * m


def _vmem_limit(block_bytes, scratch_bytes=0):
    # double-buffered blocks + scratch + margin, clamped to a safe range.
    need = 2 * block_bytes + scratch_bytes + (4 << 20)
    return int(min(max(need, 16 << 20), 64 << 20))


def _time_chunk(seq_len, max_chunk=32):
    """Largest divisor of seq_len that is <= max_chunk (timesteps per grid step)."""
    for tc in range(min(seq_len, max_chunk), 0, -1):
        if seq_len % tc == 0:
            return tc
    return 1


# ----------------------------------------------------------------------------
# Generic tiled matmul + bias:  (M, K) @ (K, N) + (1, N) -> (M, N)
# Used for (a) the hoisted LSTM input projection over the whole sequence and
# (b) the decoder. Fully parallel over the (M, N) tile grid.
# ----------------------------------------------------------------------------
def _matmul_bias_kernel(x_ref, w_ref, b_ref, o_ref):
    acc = jnp.dot(x_ref[...], w_ref[...], preferred_element_type=jnp.float32)
    o_ref[...] = (acc + b_ref[...]).astype(o_ref.dtype)


def matmul_bias(x, w_t, b, out_dtype=jnp.float32, tm=256, tn=512):
    """x: (M, K); w_t: (K, N) already transposed; b: (1, N)."""
    M, K = x.shape
    Kw, N = w_t.shape
    assert K == Kw
    tm = min(tm, _round_up(M, 8))
    tn = min(tn, _round_up(N, 128))
    Mp, Np = _round_up(M, tm), _round_up(N, tn)
    if Mp != M:
        x = jnp.pad(x, ((0, Mp - M), (0, 0)))
    if Np != N:
        w_t = jnp.pad(w_t, ((0, 0), (0, Np - N)))
        b = jnp.pad(b, ((0, 0), (0, Np - N)))

    block_bytes = (tm * K * x.dtype.itemsize
                   + K * tn * w_t.dtype.itemsize
                   + tn * b.dtype.itemsize
                   + tm * tn * jnp.dtype(out_dtype).itemsize)

    out = pl.pallas_call(
        _matmul_bias_kernel,
        out_shape=jax.ShapeDtypeStruct((Mp, Np), out_dtype),
        grid_spec=pltpu.PrefetchScalarGridSpec(
            num_scalar_prefetch=0,
            grid=(Mp // tm, Np // tn),
            in_specs=[
                pl.BlockSpec((tm, K), lambda i, j: (i, 0)),   # activations
                pl.BlockSpec((K, tn), lambda i, j: (0, j)),   # weight (pre-transposed)
                pl.BlockSpec((1, tn), lambda i, j: (0, j)),   # bias
            ],
            out_specs=pl.BlockSpec((tm, tn), lambda i, j: (i, j)),
        ),
        compiler_params=pltpu.CompilerParams(
            dimension_semantics=("parallel", "parallel"),
            vmem_limit_bytes=_vmem_limit(block_bytes)),
    )(x, w_t, b)
    if Mp != M or Np != N:
        out = out[:M, :N]
    return out


# ----------------------------------------------------------------------------
# LSTM recurrence: gx already contains x @ W_ih^T + (b_ih + b_hh) for every
# timestep. The kernel only does the serial part: h_prev @ W_hh + gates.
# Grid iterates over chunks of `tc` timesteps; h/c live in VMEM scratch and
# are carried through an unrolled inner loop; hn/cn written once at the end.
# ----------------------------------------------------------------------------
def _lstm_chunk_kernel(gx_ref, whh_ref, h0_ref, c0_ref,
                       y_ref, hn_ref, cn_ref, h_sc, c_sc, *, tc):
    chunk = pl.program_id(0)

    @pl.when(chunk == 0)
    def _():
        h_sc[...] = h0_ref[...]
        c_sc[...] = c0_ref[...]

    nh = h_sc.shape[-1]
    whh = whh_ref[...]                              # (NH, 4*NH), loaded once per chunk

    def step(i, carry):
        h_prev, c_prev = carry
        gates = gx_ref[i] + jnp.dot(h_prev.astype(whh.dtype), whh,
                                    preferred_element_type=jnp.float32)
        # NOTE: for best layout nh should be a multiple of 128 so these slices
        # are lane-aligned; they are correct (full-block) at any size.
        i_g = jax.nn.sigmoid(gates[:, 0 * nh:1 * nh])
        f_g = jax.nn.sigmoid(gates[:, 1 * nh:2 * nh])
        g_g = jnp.tanh(gates[:, 2 * nh:3 * nh])
        o_g = jax.nn.sigmoid(gates[:, 3 * nh:4 * nh])
        c = f_g * c_prev + i_g * g_g
        h = o_g * jnp.tanh(c)
        y_ref[i] = h.astype(y_ref.dtype)
        return (h, c)

    h, c = jax.lax.fori_loop(0, tc, step, (h_sc[...], c_sc[...]), unroll=True)
    h_sc[...] = h
    c_sc[...] = c

    @pl.when(chunk == pl.num_programs(0) - 1)
    def _():
        hn_ref[...] = h
        cn_ref[...] = c


def lstm_recurrent(gx, w_hh_t, h0, c0):
    """gx: (S, B, 4*NH) f32; w_hh_t: (NH, 4*NH); h0/c0: (B, NH) f32."""
    S, B, G = gx.shape
    NH = G // 4
    tc = _time_chunk(S)
    n_chunks = S // tc

    block_bytes = (tc * B * G * gx.dtype.itemsize            # gx chunk
                   + NH * G * w_hh_t.dtype.itemsize          # W_hh
                   + 2 * B * NH * 4                          # h0, c0
                   + tc * B * NH * jnp.dtype(COMPUTE_DTYPE).itemsize  # y chunk
                   + 2 * B * NH * 4)                         # hn, cn
    scratch_bytes = 2 * B * NH * 4

    y, h_n, c_n = pl.pallas_call(
        functools.partial(_lstm_chunk_kernel, tc=tc),
        out_shape=(jax.ShapeDtypeStruct((S, B, NH), COMPUTE_DTYPE),
                   jax.ShapeDtypeStruct((B, NH), STATE_DTYPE),
                   jax.ShapeDtypeStruct((B, NH), STATE_DTYPE)),
        grid_spec=pltpu.PrefetchScalarGridSpec(
            num_scalar_prefetch=0,
            grid=(n_chunks,),
            in_specs=[
                pl.BlockSpec((tc, B, G), lambda t: (t, 0, 0)),   # gx chunk
                pl.BlockSpec((NH, G), lambda t: (0, 0)),         # W_hh (invariant)
                pl.BlockSpec((B, NH), lambda t: (0, 0)),         # h0
                pl.BlockSpec((B, NH), lambda t: (0, 0)),         # c0
            ],
            out_specs=[
                pl.BlockSpec((tc, B, NH), lambda t: (t, 0, 0)),  # y chunk
                pl.BlockSpec((B, NH), lambda t: (0, 0)),         # h_n (resident)
                pl.BlockSpec((B, NH), lambda t: (0, 0)),         # c_n (resident)
            ],
            scratch_shapes=[pltpu.VMEM((B, NH), STATE_DTYPE),    # h state
                            pltpu.VMEM((B, NH), STATE_DTYPE)],   # c state
        ),
        compiler_params=pltpu.CompilerParams(
            dimension_semantics=("arbitrary",),   # time is sequential
            vmem_limit_bytes=_vmem_limit(block_bytes, scratch_bytes)),
    )(gx, w_hh_t, h0, c0)
    return y, h_n, c_n


# ----------------------------------------------------------------------------
# Full forward
# ----------------------------------------------------------------------------
@jax.jit
def rnn_model_forward(tokens, h0, c0, params):
    """tokens: (S, B) int32. h0/c0: (nlayers, B, nhid). Returns (logits, (h_n, c_n))."""
    S, B = tokens.shape
    # Embedding lookup (data-dependent gather) kept as JAX glue.
    emb = jnp.take(params["emb"], tokens, axis=0)            # (S, B, ninp) bf16
    x = emb                                                  # drop(emb): eval-mode identity

    h_list, c_list = [], []
    for l, (w_ih_t, w_hh_t, b) in enumerate(params["lstm"]):
        IN = x.shape[-1]
        G = w_ih_t.shape[-1]
        NH = G // 4
        # Hoisted, time-invariant input projection for the whole sequence.
        gx = matmul_bias(x.reshape(S * B, IN), w_ih_t, b, out_dtype=jnp.float32)
        gx = gx.reshape(S, B, G)
        y, h_n, c_n = lstm_recurrent(gx, w_hh_t, h0[l], c0[l])
        h_list.append(h_n)
        c_list.append(c_n)
        x = y                                                # inter-layer dropout: identity (eval)

    NH = x.shape[-1]
    logits2d = matmul_bias(x.reshape(S * B, NH), params["dec_w_t"], params["dec_b"],
                           out_dtype=jnp.float32)
    logits = logits2d.reshape(S, B, -1)
    return logits, (jnp.stack(h_list, axis=0), jnp.stack(c_list, axis=0))


def init_params(key, ntoken, ninp, nhid, nlayers):
    initRange = 0.1
    stdv = 1.0 / (nhid ** 0.5)
    keys = jax.random.split(key, 2 + 4 * nlayers)
    emb = jax.random.uniform(keys[0], (ntoken, ninp), jnp.float32, -initRange, initRange)
    dec_w = jax.random.uniform(keys[1], (ntoken, nhid), jnp.float32, -initRange, initRange)
    params = {
        "emb": emb.astype(COMPUTE_DTYPE),
        "dec_w_t": dec_w.T.astype(COMPUTE_DTYPE),            # (nhid, ntoken) pre-transposed
        "dec_b": jnp.zeros((1, ntoken), jnp.float32),
    }
    lstm = []
    for l in range(nlayers):
        in_sz = ninp if l == 0 else nhid
        k = keys[2 + 4 * l: 2 + 4 * (l + 1)]
        w_ih = jax.random.uniform(k[0], (4 * nhid, in_sz), jnp.float32, -stdv, stdv)
        w_hh = jax.random.uniform(k[1], (4 * nhid, nhid), jnp.float32, -stdv, stdv)
        b_ih = jax.random.uniform(k[2], (4 * nhid,), jnp.float32, -stdv, stdv)
        b_hh = jax.random.uniform(k[3], (4 * nhid,), jnp.float32, -stdv, stdv)
        lstm.append((w_ih.T.astype(COMPUTE_DTYPE),            # (in, 4*nhid)
                     w_hh.T.astype(COMPUTE_DTYPE),            # (nhid, 4*nhid)
                     (b_ih + b_hh).reshape(1, 4 * nhid)))     # folded bias, f32
    params["lstm"] = tuple(lstm)
    return params


if __name__ == "__main__":
    ntoken, ninp, nhid, nlayers = 32, 32, 32, 2
    seq, batch = 8, 2

    key = jax.random.PRNGKey(0)
    k_param, k_tok = jax.random.split(key)
    params = init_params(k_param, ntoken, ninp, nhid, nlayers)

    tokens = jax.random.randint(k_tok, (seq, batch), 0, ntoken, dtype=jnp.int32)
    h0 = jnp.zeros((nlayers, batch, nhid), jnp.float32)
    c0 = jnp.zeros((nlayers, batch, nhid), jnp.float32)

    logits, (h_n, c_n) = rnn_model_forward(tokens, h0, c0, params)
    jax.block_until_ready((logits, h_n, c_n))

    assert logits.shape == (seq, batch, ntoken)
    assert h_n.shape == (nlayers, batch, nhid)
    assert c_n.shape == (nlayers, batch, nhid)
    assert bool(jnp.isfinite(logits).all())
    print("KERNEL_OK")
</pallas_src>

<mosaic_0001>
module attributes {stable_mosaic.version = 11 : i64} {
  func.func @_matmul_bias_kernel(%arg0: i32, %arg1: i32, %arg2: memref<16x32xbf16, #tpu.memory_space<vmem>>, %arg3: memref<32x128xbf16, #tpu.memory_space<vmem>>, %arg4: memref<1x128xf32, #tpu.memory_space<vmem>>, %arg5: memref<16x128xf32, #tpu.memory_space<vmem>>) attributes {dimension_semantics = [#tpu.dimension_semantics<parallel>, #tpu.dimension_semantics<parallel>], iteration_bounds = array<i64: 1, 1>, scalar_prefetch = 0 : i64, scratch_operands = 0 : i64, tpu.core_type = #tpu.core_type<tc>, window_params = [{transform_indices = @transform_0, window_bounds = array<i64: 16, 32>}, {transform_indices = @transform_1, window_bounds = array<i64: 32, 128>}, {transform_indices = @transform_2, window_bounds = array<i64: 1, 128>}, {transform_indices = @transform_3, window_bounds = array<i64: 16, 128>}]} {
    %c0 = arith.constant 0 : index
    %c0_0 = arith.constant 0 : index
    %0 = vector.load %arg2[%c0, %c0_0] : memref<16x32xbf16, #tpu.memory_space<vmem>>, vector<16x32xbf16>
    %c0_1 = arith.constant 0 : index
    %c0_2 = arith.constant 0 : index
    %1 = vector.load %arg3[%c0_1, %c0_2] : memref<32x128xbf16, #tpu.memory_space<vmem>>, vector<32x128xbf16>
    %cst = arith.constant dense<0.000000e+00> : vector<16x128xf32>
    %2 = tpu.matmul %0, %1, %cst {dimension_numbers = #tpu.dot_dimension_numbers<[1], [0], [0], [1], [0, 0, 1, 1], [], []>} : vector<16x32xbf16>, vector<32x128xbf16>, vector<16x128xf32> -> vector<16x128xf32>
    %c0_3 = arith.constant 0 : index
    %c0_4 = arith.constant 0 : index
    %3 = vector.load %arg4[%c0_3, %c0_4] : memref<1x128xf32, #tpu.memory_space<vmem>>, vector<1x128xf32>
    %4 = vector.broadcast %3 : vector<1x128xf32> to vector<16x128xf32>
    %5 = arith.addf %2, %4 : vector<16x128xf32>
    %c0_5 = arith.constant 0 : index
    %c0_6 = arith.constant 0 : index
    %6 = vector.load %arg5[%c0_5, %c0_6] : memref<16x128xf32, #tpu.memory_space<vmem>>, vector<16x128xf32>
    tpu.vector_store %arg5[%c0_5, %c0_6], %5 {strides = array<i32>} : memref<16x128xf32, #tpu.memory_space<vmem>>, vector<16x128xf32>,
    return
  }
  func.func @transform_0(%arg0: i32, %arg1: i32) -> (i32, i32) {
    %c0_i32 = arith.constant 0 : i32
    %c0_i32_0 = arith.constant 0 : i32
    return %arg0, %c0_i32 : i32, i32
  }
  func.func @transform_1(%arg0: i32, %arg1: i32) -> (i32, i32) {
    %c0_i32 = arith.constant 0 : i32
    %c0_i32_0 = arith.constant 0 : i32
    return %c0_i32, %arg1 : i32, i32
  }
  func.func @transform_2(%arg0: i32, %arg1: i32) -> (i32, i32) {
    %c0_i32 = arith.constant 0 : i32
    %c0_i32_0 = arith.constant 0 : i32
    return %c0_i32, %arg1 : i32, i32
  }
  func.func @transform_3(%arg0: i32, %arg1: i32) -> (i32, i32) {
    %c0_i32 = arith.constant 0 : i32
    return %arg0, %arg1 : i32, i32
  }
}

module attributes {stable_mosaic.version = 11 : i64} {
  func.func @_matmul_bias_kernel(%arg0: i32, %arg1: i32, %arg2: memref<16x32xbf16, #tpu.memory_space<vmem>>, %arg3: memref<32x128xbf16, #tpu.memory_space<vmem>>, %arg4: memref<1x128xf32, #tpu.memory_space<vmem>>, %arg5: memref<16x128xf32, #tpu.memory_space<vmem>>) attributes {dimension_semantics = [#tpu.dimension_semantics<parallel>, #tpu.dimension_semantics<parallel>], iteration_bounds = array<i64: 1, 1>, scalar_prefetch = 0 : i64, scratch_operands = 0 : i64, tpu.core_type = #tpu.core_type<tc>, window_params = [{transform_indices = @transform_0, window_bounds = array<i64: 16, 32>}, {transform_indices = @transform_1, window_bounds = array<i64: 32, 128>}, {transform_indices = @transform_2, window_bounds = array<i64: 1, 128>}, {transform_indices = @transform_3, window_bounds = array<i64: 16, 128>}]} {
    %c0 = arith.constant 0 : index
    %c0_0 = arith.constant 0 : index
    %0 = vector.load %arg2[%c0, %c0_0] : memref<16x32xbf16, #tpu.memory_space<vmem>>, vector<16x32xbf16>
    %c0_1 = arith.constant 0 : index
    %c0_2 = arith.constant 0 : index
    %1 = vector.load %arg3[%c0_1, %c0_2] : memref<32x128xbf16, #tpu.memory_space<vmem>>, vector<32x128xbf16>
    %cst = arith.constant dense<0.000000e+00> : vector<16x128xf32>
    %2 = tpu.matmul %0, %1, %cst {dimension_numbers = #tpu.dot_dimension_numbers<[1], [0], [0], [1], [0, 0, 1, 1], [], []>} : vector<16x32xbf16>, vector<32x128xbf16>, vector<16x128xf32> -> vector<16x128xf32>
    %c0_3 = arith.constant 0 : index
    %c0_4 = arith.constant 0 : index
    %3 = vector.load %arg4[%c0_3, %c0_4] : memref<1x128xf32, #tpu.memory_space<vmem>>, vector<1x128xf32>
    %4 = vector.broadcast %3 : vector<1x128xf32> to vector<16x128xf32>
    %5 = arith.addf %2, %4 : vector<16x128xf32>
    %c0_5 = arith.constant 0 : index
    %c0_6 = arith.constant 0 : index
    %6 = vector.load %arg5[%c0_5, %c0_6] : memref<16x128xf32, #tpu.memory_space<vmem>>, vector<16x128xf32>
    tpu.vector_store %arg5[%c0_5, %c0_6], %5 {strides = array<i32>} : memref<16x128xf32, #tpu.memory_space<vmem>>, vector<16x128xf32>,
    return
  }
  func.func @transform_0(%arg0: i32, %arg1: i32) -> (i32, i32) {
    %c0_i32 = arith.constant 0 : i32
    %c0_i32_0 = arith.constant 0 : i32
    return %arg0, %c0_i32 : i32, i32
  }
  func.func @transform_1(%arg0: i32, %arg1: i32) -> (i32, i32) {
    %c0_i32 = arith.constant 0 : i32
    %c0_i32_0 = arith.constant 0 : i32
    return %c0_i32, %arg1 : i32, i32
  }
  func.func @transform_2(%arg0: i32, %arg1: i32) -> (i32, i32) {
    %c0_i32 = arith.constant 0 : i32
    %c0_i32_0 = arith.constant 0 : i32
    return %c0_i32, %arg1 : i32, i32
  }
  func.func @transform_3(%arg0: i32, %arg1: i32) -> (i32, i32) {
    %c0_i32 = arith.constant 0 : i32
    return %arg0, %arg1 : i32, i32
  }
}

module attributes {stable_mosaic.version = 11 : i64} {
  func.func @_lstm_chunk_kernel(%arg0: i32, %arg1: memref<8x2x128xf32, #tpu.memory_space<vmem>>, %arg2: memref<32x128xbf16, #tpu.memory_space<vmem>>, %arg3: memref<2x32xf32, #tpu.memory_space<vmem>>, %arg4: memref<2x32xf32, #tpu.memory_space<vmem>>, %arg5: memref<8x2x32xbf16, #tpu.memory_space<vmem>>, %arg6: memref<2x32xf32, #tpu.memory_space<vmem>>, %arg7: memref<2x32xf32, #tpu.memory_space<vmem>>, %arg8: memref<2x32xf32, #tpu.memory_space<vmem>>, %arg9: memref<2x32xf32, #tpu.memory_space<vmem>>) attributes {dimension_semantics = [#tpu.dimension_semantics<arbitrary>], iteration_bounds = array<i64: 1>, scalar_prefetch = 0 : i64, scratch_operands = 2 : i64, tpu.core_type = #tpu.core_type<tc>, window_params = [{transform_indices = @transform_0, window_bounds = array<i64: 8, 2, 128>}, {pipeline_mode = #tpu.pipeline_mode<synchronous>, transform_indices = @transform_1, window_bounds = array<i64: 32, 128>}, {pipeline_mode = #tpu.pipeline_mode<synchronous>, transform_indices = @transform_2, window_bounds = array<i64: 2, 32>}, {pipeline_mode = #tpu.pipeline_mode<synchronous>, transform_indices = @transform_3, window_bounds = array<i64: 2, 32>}, {transform_indices = @transform_4, window_bounds = array<i64: 8, 2, 32>}, {pipeline_mode = #tpu.pipeline_mode<synchronous>, transform_indices = @transform_5, window_bounds = array<i64: 2, 32>}, {pipeline_mode = #tpu.pipeline_mode<synchronous>, transform_indices = @transform_6, window_bounds = array<i64: 2, 32>}]} {
    %c0_i32 = arith.constant 0 : i32
    %0 = arith.cmpi eq, %arg0, %c0_i32 : i32
    %1 = arith.extui %0 : i1 to i32
    %c0_i32_0 = arith.constant 0 : i32
    %2 = arith.cmpi ne, %1, %c0_i32_0 : i32
    scf.if %2 {
      %c0_76 = arith.constant 0 : index
      %c0_77 = arith.constant 0 : index
      %299 = vector.load %arg3[%c0_76, %c0_77] : memref<2x32xf32, #tpu.memory_space<vmem>>, vector<2x32xf32>
      %c0_78 = arith.constant 0 : index
      %c0_79 = arith.constant 0 : index
      %300 = vector.load %arg8[%c0_78, %c0_79] : memref<2x32xf32, #tpu.memory_space<vmem>>, vector<2x32xf32>
      tpu.vector_store %arg8[%c0_78, %c0_79], %299 {strides = array<i32>} : memref<2x32xf32, #tpu.memory_space<vmem>>, vector<2x32xf32>,
      %c0_80 = arith.constant 0 : index
      %c0_81 = arith.constant 0 : index
      %301 = vector.load %arg4[%c0_80, %c0_81] : memref<2x32xf32, #tpu.memory_space<vmem>>, vector<2x32xf32>
      %c0_82 = arith.constant 0 : index
      %c0_83 = arith.constant 0 : index
      %302 = vector.load %arg9[%c0_82, %c0_83] : memref<2x32xf32, #tpu.memory_space<vmem>>, vector<2x32xf32>
      tpu.vector_store %arg9[%c0_82, %c0_83], %301 {strides = array<i32>} : memref<2x32xf32, #tpu.memory_space<vmem>>, vector<2x32xf32>,
    } else {
    }
    %c0 = arith.constant 0 : index
    %c0_1 = arith.constant 0 : index
    %3 = vector.load %arg2[%c0, %c0_1] : memref<32x128xbf16, #tpu.memory_space<vmem>>, vector<32x128xbf16>
    %c0_2 = arith.constant 0 : index
    %c0_3 = arith.constant 0 : index
    %4 = vector.load %arg8[%c0_2, %c0_3] : memref<2x32xf32, #tpu.memory_space<vmem>>, vector<2x32xf32>
    %c0_4 = arith.constant 0 : index
    %c0_5 = arith.constant 0 : index
    %5 = vector.load %arg9[%c0_4, %c0_5] : memref<2x32xf32, #tpu.memory_space<vmem>>, vector<2x32xf32>
    %c0_i32_6 = arith.constant 0 : i32
    %6 = arith.index_cast %c0_i32_6 : i32 to index
    %c0_7 = arith.constant 0 : index
    %c0_8 = arith.constant 0 : index
    %7 = vector.load %arg1[%6, %c0_7, %c0_8] : memref<8x2x128xf32, #tpu.memory_space<vmem>>, vector<1x2x128xf32>
    %8 = vector.shape_cast %7 : vector<1x2x128xf32> to vector<2x128xf32>
    %9 = arith.truncf %4 : vector<2x32xf32> to vector<2x32xbf16>
    %cst = arith.constant dense<0.000000e+00> : vector<2x128xf32>
    %10 = tpu.matmul %9, %3, %cst {dimension_numbers = #tpu.dot_dimension_numbers<[1], [0], [0], [1], [0, 0, 1, 1], [], []>} : vector<2x32xbf16>, vector<32x128xbf16>, vector<2x128xf32> -> vector<2x128xf32>
    %11 = arith.addf %8, %10 : vector<2x128xf32>
    %12 = vector.extract_strided_slice %11 {offsets = [0, 0], sizes = [2, 32], strides = [1, 1]} : vector<2x128xf32> to vector<2x32xf32>
    %13 = arith.negf %12 : vector<2x32xf32>
    %14 = math.exp %13 : vector<2x32xf32>
    %cst_9 = arith.constant 1.000000e+00 : f32
    %15 = vector.broadcast %cst_9 : f32 to vector<2x32xf32>
    %16 = arith.addf %15, %14 : vector<2x32xf32>
    %17 = arith.divf %15, %16 : vector<2x32xf32>
    %18 = vector.extract_strided_slice %11 {offsets = [0, 32], sizes = [2, 32], strides = [1, 1]} : vector<2x128xf32> to vector<2x32xf32>
    %19 = arith.negf %18 : vector<2x32xf32>
    %20 = math.exp %19 : vector<2x32xf32>
    %cst_10 = arith.constant 1.000000e+00 : f32
    %21 = vector.broadcast %cst_10 : f32 to vector<2x32xf32>
    %22 = arith.addf %21, %20 : vector<2x32xf32>
    %23 = arith.divf %21, %22 : vector<2x32xf32>
    %24 = vector.extract_strided_slice %11 {offsets = [0, 64], sizes = [2, 32], strides = [1, 1]} : vector<2x128xf32> to vector<2x32xf32>
    %25 = math.tanh %24 : vector<2x32xf32>
    %26 = vector.extract_strided_slice %11 {offsets = [0, 96], sizes = [2, 32], strides = [1, 1]} : vector<2x128xf32> to vector<2x32xf32>
    %27 = arith.negf %26 : vector<2x32xf32>
    %28 = math.exp %27 : vector<2x32xf32>
    %cst_11 = arith.constant 1.000000e+00 : f32
    %29 = vector.broadcast %cst_11 : f32 to vector<2x32xf32>
    %30 = arith.addf %29, %28 : vector<2x32xf32>
    %31 = arith.divf %29, %30 : vector<2x32xf32>
    %32 = arith.mulf %23, %5 : vector<2x32xf32>
    %33 = arith.mulf %17, %25 : vector<2x32xf32>
    %34 = arith.addf %32, %33 : vector<2x32xf32>
    %35 = math.tanh %34 : vector<2x32xf32>
    %36 = arith.mulf %31, %35 : vector<2x32xf32>
    %37 = arith.truncf %36 : vector<2x32xf32> to vector<2x32xbf16>
    %38 = arith.index_cast %c0_i32_6 : i32 to index
    %c0_12 = arith.constant 0 : index
    %c0_13 = arith.constant 0 : index
    %39 = vector.load %arg5[%38, %c0_12, %c0_13] : memref<8x2x32xbf16, #tpu.memory_space<vmem>>, vector<1x2x32xbf16>
    %40 = vector.shape_cast %39 : vector<1x2x32xbf16> to vector<2x32xbf16>
    %41 = vector.shape_cast %37 : vector<2x32xbf16> to vector<1x2x32xbf16>
    tpu.vector_store %arg5[%38, %c0_12, %c0_13], %41 {strides = array<i32>} : memref<8x2x32xbf16, #tpu.memory_space<vmem>>, vector<1x2x32xbf16>,
    %c1_i32 = arith.constant 1 : i32
    %42 = arith.index_cast %c1_i32 : i32 to index
    %c0_14 = arith.constant 0 : index
    %c0_15 = arith.constant 0 : index
    %43 = vector.load %arg1[%42, %c0_14, %c0_15] : memref<8x2x128xf32, #tpu.memory_space<vmem>>, vector<1x2x128xf32>
    %44 = vector.shape_cast %43 : vector<1x2x128xf32> to vector<2x128xf32>
    %45 = arith.truncf %36 : vector<2x32xf32> to vector<2x32xbf16>
    %cst_16 = arith.constant dense<0.000000e+00> : vector<2x128xf32>
    %46 = tpu.matmul %45, %3, %cst_16 {dimension_numbers = #tpu.dot_dimension_numbers<[1], [0], [0], [1], [0, 0, 1, 1], [], []>} : vector<2x32xbf16>, vector<32x128xbf16>, vector<2x128xf32> -> vector<2x128xf32>
    %47 = arith.addf %44, %46 : vector<2x128xf32>
    %48 = vector.extract_strided_slice %47 {offsets = [0, 0], sizes = [2, 32], strides = [1, 1]} : vector<2x128xf32> to vector<2x32xf32>
    %49 = arith.negf %48 : vector<2x32xf32>
    %50 = math.exp %49 : vector<2x32xf32>
    %cst_17 = arith.constant 1.000000e+00 : f32
    %51 = vector.broadcast %cst_17 : f32 to vector<2x32xf32>
    %52 = arith.addf %51, %50 : vector<2x32xf32>
    %53 = arith.divf %51, %52 : vector<2x32xf32>
    %54 = vector.extract_strided_slice %47 {offsets = [0, 32], sizes = [2, 32], strides = [1, 1]} : vector<2x128xf32> to vector<2x32xf32>
    %55 = arith.negf %54 : vector<2x32xf32>
    %56 = math.exp %55 : vector<2x32xf32>
    %cst_18 = arith.constant 1.000000e+00 : f32
    %57 = vector.broadcast %cst_18 : f32 to vector<2x32xf32>
    %58 = arith.addf %57, %56 : vector<2x32xf32>
    %59 = arith.divf %57, %58 : vector<2x32xf32>
    %60 = vector.extract_strided_slice %47 {offsets = [0, 64], sizes = [2, 32], strides = [1, 1]} : vector<2x128xf32> to vector<2x32xf32>
    %61 = math.tanh %60 : vector<2x32xf32>
    %62 = vector.extract_strided_slice %47 {offsets = [0, 96], sizes = [2, 32], strides = [1, 1]} : vector<2x128xf32> to vector<2x32xf32>
    %63 = arith.negf %62 : vector<2x32xf32>
    %64 = math.exp %63 : vector<2x32xf32>
    %cst_19 = arith.constant 1.000000e+00 : f32
    %65 = vector.broadcast %cst_19 : f32 to vector<2x32xf32>
    %66 = arith.addf %65, %64 : vector<2x32xf32>
    %67 = arith.divf %65, %66 : vector<2x32xf32>
    %68 = arith.mulf %59, %34 : vector<2x32xf32>
    %69 = arith.mulf %53, %61 : vector<2x32xf32>
    %70 = arith.addf %68, %69 : vector<2x32xf32>
    %71 = math.tanh %70 : vector<2x32xf32>
    %72 = arith.mulf %67, %71 : vector<2x32xf32>
    %73 = arith.truncf %72 : vector<2x32xf32> to vector<2x32xbf16>
    %74 = arith.index_cast %c1_i32 : i32 to index
    %c0_20 = arith.constant 0 : index
    %c0_21 = arith.constant 0 : index
    %75 = vector.load %arg5[%74, %c0_20, %c0_21] : memref<8x2x32xbf16, #tpu.memory_space<vmem>>, vector<1x2x32xbf16>
    %76 = vector.shape_cast %75 : vector<1x2x32xbf16> to vector<2x32xbf16>
    %77 = vector.shape_cast %73 : vector<2x32xbf16> to vector<1x2x32xbf16>
    tpu.vector_store %arg5[%74, %c0_20, %c0_21], %77 {strides = array<i32>} : memref<8x2x32xbf16, #tpu.memory_space<vmem>>, vector<1x2x32xbf16>,
    %c2_i32 = arith.constant 2 : i32
    %78 = arith.index_cast %c2_i32 : i32 to index
    %c0_22 = arith.constant 0 : index
    %c0_23 = arith.constant 0 : index
    %79 = vector.load %arg1[%78, %c0_22, %c0_23] : memref<8x2x128xf32, #tpu.memory_space<vmem>>, vector<1x2x128xf32>
    %80 = vector.shape_cast %79 : vector<1x2x128xf32> to vector<2x128xf32>
    %81 = arith.truncf %72 : vector<2x32xf32> to vector<2x32xbf16>
    %cst_24 = arith.constant dense<0.000000e+00> : vector<2x128xf32>
    %82 = tpu.matmul %81, %3, %cst_24 {dimension_numbers = #tpu.dot_dimension_numbers<[1], [0], [0], [1], [0, 0, 1, 1], [], []>} : vector<2x32xbf16>, vector<32x128xbf16>, vector<2x128xf32> -> vector<2x128xf32>
    %83 = arith.addf %80, %82 : vector<2x128xf32>
    %84 = vector.extract_strided_slice %83 {offsets = [0, 0], sizes = [2, 32], strides = [1, 1]} : vector<2x128xf32> to vector<2x32xf32>
    %85 = arith.negf %84 : vector<2x32xf32>
    %86 = math.exp %85 : vector<2x32xf32>
    %cst_25 = arith.constant 1.000000e+00 : f32
    %87 = vector.broadcast %cst_25 : f32 to vector<2x32xf32>
    %88 = arith.addf %87, %86 : vector<2x32xf32>
    %89 = arith.divf %87, %88 : vector<2x32xf32>
    %90 = vector.extract_strided_slice %83 {offsets = [0, 32], sizes = [2, 32], strides = [1, 1]} : vector<2x128xf32> to vector<2x32xf32>
    %91 = arith.negf %90 : vector<2x32xf32>
    %92 = math.exp %91 : vector<2x32xf32>
    %cst_26 = arith.constant 1.000000e+00 : f32
    %93 = vector.broadcast %cst_26 : f32 to vector<2x32xf32>
    %94 = arith.addf %93, %92 : vector<2x32xf32>
    %95 = arith.divf %93, %94 : vector<2x32xf32>
    %96 = vector.extract_strided_slice %83 {offsets = [0, 64], sizes = [2, 32], strides = [1, 1]} : vector<2x128xf32> to vector<2x32xf32>
    %97 = math.tanh %96 : vector<2x32xf32>
    %98 = vector.extract_strided_slice %83 {offsets = [0, 96], sizes = [2, 32], strides = [1, 1]} : vector<2x128xf32> to vector<2x32xf32>
    %99 = arith.negf %98 : vector<2x32xf32>
    %100 = math.exp %99 : vector<2x32xf32>
    %cst_27 = arith.constant 1.000000e+00 : f32
    %101 = vector.broadcast %cst_27 : f32 to vector<2x32xf32>
    %102 = arith.addf %101, %100 : vector<2x32xf32>
    %103 = arith.divf %101, %102 : vector<2x32xf32>
    %104 = arith.mulf %95, %70 : vector<2x32xf32>
    %105 = arith.mulf %89, %97 : vector<2x32xf32>
    %106 = arith.addf %104, %105 : vector<2x32xf32>
    %107 = math.tanh %106 : vector<2x32xf32>
    %108 = arith.mulf %103, %107 : vector<2x32xf32>
    %109 = arith.truncf %108 : vector<2x32xf32> to vector<2x32xbf16>
    %110 = arith.index_cast %c2_i32 : i32 to index
    %c0_28 = arith.constant 0 : index
    %c0_29 = arith.constant 0 : index
    %111 = vector.load %arg5[%110, %c0_28, %c0_29] : memref<8x2x32xbf16, #tpu.memory_space<vmem>>, vector<1x2x32xbf16>
    %112 = vector.shape_cast %111 : vector<1x2x32xbf16> to vector<2x32xbf16>
    %113 = vector.shape_cast %109 : vector<2x32xbf16> to vector<1x2x32xbf16>
    tpu.vector_store %arg5[%110, %c0_28, %c0_29], %113 {strides = array<i32>} : memref<8x2x32xbf16, #tpu.memory_space<vmem>>, vector<1x2x32xbf16>,
    %c3_i32 = arith.constant 3 : i32
    %114 = arith.index_cast %c3_i32 : i32 to index
    %c0_30 = arith.constant 0 : index
    %c0_31 = arith.constant 0 : index
    %115 = vector.load %arg1[%114, %c0_30, %c0_31] : memref<8x2x128xf32, #tpu.memory_space<vmem>>, vector<1x2x128xf32>
    %116 = vector.shape_cast %115 : vector<1x2x128xf32> to vector<2x128xf32>
    %117 = arith.truncf %108 : vector<2x32xf32> to vector<2x32xbf16>
    %cst_32 = arith.constant dense<0.000000e+00> : vector<2x128xf32>
    %118 = tpu.matmul %117, %3, %cst_32 {dimension_numbers = #tpu.dot_dimension_numbers<[1], [0], [0], [1], [0, 0, 1, 1], [], []>} : vector<2x32xbf16>, vector<32x128xbf16>, vector<2x128xf32> -> vector<2x128xf32>
    %119 = arith.addf %116, %118 : vector<2x128xf32>
    %120 = vector.extract_strided_slice %119 {offsets = [0, 0], sizes = [2, 32], strides = [1, 1]} : vector<2x128xf32> to vector<2x32xf32>
    %121 = arith.negf %120 : vector<2x32xf32>
    %122 = math.exp %121 : vector<2x32xf32>
    %cst_33 = arith.constant 1.000000e+00 : f32
    %123 = vector.broadcast %cst_33 : f32 to vector<2x32xf32>
    %124 = arith.addf %123, %122 : vector<2x32xf32>
    %125 = arith.divf %123, %124 : vector<2x32xf32>
    %126 = vector.extract_strided_slice %119 {offsets = [0, 32], sizes = [2, 32], strides = [1, 1]} : vector<2x128xf32> to vector<2x32xf32>
    %127 = arith.negf %126 : vector<2x32xf32>
    %128 = math.exp %127 : vector<2x32xf32>
    %cst_34 = arith.constant 1.000000e+00 : f32
    %129 = vector.broadcast %cst_34 : f32 to vector<2x32xf32>
    %130 = arith.addf %129, %128 : vector<2x32xf32>
    %131 = arith.divf %129, %130 : vector<2x32xf32>
    %132 = vector.extract_strided_slice %119 {offsets = [0, 64], sizes = [2, 32], strides = [1, 1]} : vector<2x128xf32> to vector<2x32xf32>
    %133 = math.tanh %132 : vector<2x32xf32>
    %134 = vector.extract_strided_slice %119 {offsets = [0, 96], sizes = [2, 32], strides = [1, 1]} : vector<2x128xf32> to vector<2x32xf32>
    %135 = arith.negf %134 : vector<2x32xf32>
    %136 = math.exp %135 : vector<2x32xf32>
    %cst_35 = arith.constant 1.000000e+00 : f32
    %137 = vector.broadcast %cst_35 : f32 to vector<2x32xf32>
    %138 = arith.addf %137, %136 : vector<2x32xf32>
    %139 = arith.divf %137, %138 : vector<2x32xf32>
    %140 = arith.mulf %131, %106 : vector<2x32xf32>
    %141 = arith.mulf %125, %133 : vector<2x32xf32>
    %142 = arith.addf %140, %141 : vector<2x32xf32>
    %143 = math.tanh %142 : vector<2x32xf32>
    %144 = arith.mulf %139, %143 : vector<2x32xf32>
    %145 = arith.truncf %144 : vector<2x32xf32> to vector<2x32xbf16>
    %146 = arith.index_cast %c3_i32 : i32 to index
    %c0_36 = arith.constant 0 : index
    %c0_37 = arith.constant 0 : index
    %147 = vector.load %arg5[%146, %c0_36, %c0_37] : memref<8x2x32xbf16, #tpu.memory_space<vmem>>, vector<1x2x32xbf16>
    %148 = vector.shape_cast %147 : vector<1x2x32xbf16> to vector<2x32xbf16>
    %149 = vector.shape_cast %145 : vector<2x32xbf16> to vector<1x2x32xbf16>
    tpu.vector_store %arg5[%146, %c0_36, %c0_37], %149 {strides = array<i32>} : memref<8x2x32xbf16, #tpu.memory_space<vmem>>, vector<1x2x32xbf16>,
    %c4_i32 = arith.constant 4 : i32
    %150 = arith.index_cast %c4_i32 : i32 to index
    %c0_38 = arith.constant 0 : index
    %c0_39 = arith.constant 0 : index
    %151 = vector.load %arg1[%150, %c0_38, %c0_39] : memref<8x2x128xf32, #tpu.memory_space<vmem>>, vector<1x2x128xf32>
    %152 = vector.shape_cast %151 : vector<1x2x128xf32> to vector<2x128xf32>
    %153 = arith.truncf %144 : vector<2x32xf32> to vector<2x32xbf16>
    %cst_40 = arith.constant dense<0.000000e+00> : vector<2x128xf32>
    %154 = tpu.matmul %153, %3, %cst_40 {dimension_numbers = #tpu.dot_dimension_numbers<[1], [0], [0], [1], [0, 0, 1, 1], [], []>} : vector<2x32xbf16>, vector<32x128xbf16>, vector<2x128xf32> -> vector<2x128xf32>
    %155 = arith.addf %152, %154 : vector<2x128xf32>
    %156 = vector.extract_strided_slice %155 {offsets = [0, 0], sizes = [2, 32], strides = [1, 1]} : vector<2x128xf32> to vector<2x32xf32>
    %157 = arith.negf %156 : vector<2x32xf32>
    %158 = math.exp %157 : vector<2x32xf32>
    %cst_41 = arith.constant 1.000000e+00 : f32
    %159 = vector.broadcast %cst_41 : f32 to vector<2x32xf32>
    %160 = arith.addf %159, %158 : vector<2x32xf32>
    %161 = arith.divf %159, %160 : vector<2x32xf32>
    %162 = vector.extract_strided_slice %155 {offsets = [0, 32], sizes = [2, 32], strides = [1, 1]} : vector<2x128xf32> to vector<2x32xf32>
    %163 = arith.negf %162 : vector<2x32xf32>
    %164 = math.exp %163 : vector<2x32xf32>
    %cst_42 = arith.constant 1.000000e+00 : f32
    %165 = vector.broadcast %cst_42 : f32 to vector<2x32xf32>
    %166 = arith.addf %165, %164 : vector<2x32xf32>
    %167 = arith.divf %165, %166 : vector<2x32xf32>
    %168 = vector.extract_strided_slice %155 {offsets = [0, 64], sizes = [2, 32], strides = [1, 1]} : vector<2x128xf32> to vector<2x32xf32>
    %169 = math.tanh %168 : vector<2x32xf32>
    %170 = vector.extract_strided_slice %155 {offsets = [0, 96], sizes = [2, 32], strides = [1, 1]} : vector<2x128xf32> to vector<2x32xf32>
    %171 = arith.negf %170 : vector<2x32xf32>
    %172 = math.exp %171 : vector<2x32xf32>
    %cst_43 = arith.constant 1.000000e+00 : f32
    %173 = vector.broadcast %cst_43 : f32 to vector<2x32xf32>
    %174 = arith.addf %173, %172 : vector<2x32xf32>
    %175 = arith.divf %173, %174 : vector<2x32xf32>
    %176 = arith.mulf %167, %142 : vector<2x32xf32>
    %177 = arith.mulf %161, %169 : vector<2x32xf32>
    %178 = arith.addf %176, %177 : vector<2x32xf32>
    %179 = math.tanh %178 : vector<2x32xf32>
    %180 = arith.mulf %175, %179 : vector<2x32xf32>
    %181 = arith.truncf %180 : vector<2x32xf32> to vector<2x32xbf16>
    %182 = arith.index_cast %c4_i32 : i32 to index
    %c0_44 = arith.constant 0 : index
    %c0_45 = arith.constant 0 : index
    %183 = vector.load %arg5[%182, %c0_44, %c0_45] : memref<8x2x32xbf16, #tpu.memory_space<vmem>>, vector<1x2x32xbf16>
    %184 = vector.shape_cast %183 : vector<1x2x32xbf16> to vector<2x32xbf16>
    %185 = vector.shape_cast %181 : vector<2x32xbf16> to vector<1x2x32xbf16>
    tpu.vector_store %arg5[%182, %c0_44, %c0_45], %185 {strides = array<i32>} : memref<8x2x32xbf16, #tpu.memory_space<vmem>>, vector<1x2x32xbf16>,
    %c5_i32 = arith.constant 5 : i32
    %186 = arith.index_cast %c5_i32 : i32 to index
    %c0_46 = arith.constant 0 : index
    %c0_47 = arith.constant 0 : index
    %187 = vector.load %arg1[%186, %c0_46, %c0_47] : memref<8x2x128xf32, #tpu.memory_space<vmem>>, vector<1x2x128xf32>
    %188 = vector.shape_cast %187 : vector<1x2x128xf32> to vector<2x128xf32>
    %189 = arith.truncf %180 : vector<2x32xf32> to vector<2x32xbf16>
    %cst_48 = arith.constant dense<0.000000e+00> : vector<2x128xf32>
    %190 = tpu.matmul %189, %3, %cst_48 {dimension_numbers = #tpu.dot_dimension_numbers<[1], [0], [0], [1], [0, 0, 1, 1], [], []>} : vector<2x32xbf16>, vector<32x128xbf16>, vector<2x128xf32> -> vector<2x128xf32>
    %191 = arith.addf %188, %190 : vector<2x128xf32>
    %192 = vector.extract_strided_slice %191 {offsets = [0, 0], sizes = [2, 32], strides = [1, 1]} : vector<2x128xf32> to vector<2x32xf32>
    %193 = arith.negf %192 : vector<2x32xf32>
    %194 = math.exp %193 : vector<2x32xf32>
    %cst_49 = arith.constant 1.000000e+00 : f32
    %195 = vector.broadcast %cst_49 : f32 to vector<2x32xf32>
    %196 = arith.addf %195, %194 : vector<2x32xf32>
    %197 = arith.divf %195, %196 : vector<2x32xf32>
    %198 = vector.extract_strided_slice %191 {offsets = [0, 32], sizes = [2, 32], strides = [1, 1]} : vector<2x128xf32> to vector<2x32xf32>
    %199 = arith.negf %198 : vector<2x32xf32>
    %200 = math.exp %199 : vector<2x32xf32>
    %cst_50 = arith.constant 1.000000e+00 : f32
    %201 = vector.broadcast %cst_50 : f32 to vector<2x32xf32>
    %202 = arith.addf %201, %200 : vector<2x32xf32>
    %203 = arith.divf %201, %202 : vector<2x32xf32>
    %204 = vector.extract_strided_slice %191 {offsets = [0, 64], sizes = [2, 32], strides = [1, 1]} : vector<2x128xf32> to vector<2x32xf32>
    %205 = math.tanh %204 : vector<2x32xf32>
    %206 = vector.extract_strided_slice %191 {offsets = [0, 96], sizes = [2, 32], strides = [1, 1]} : vector<2x128xf32> to vector<2x32xf32>
    %207 = arith.negf %206 : vector<2x32xf32>
    %208 = math.exp %207 : vector<2x32xf32>
    %cst_51 = arith.constant 1.000000e+00 : f32
    %209 = vector.broadcast %cst_51 : f32 to vector<2x32xf32>
    %210 = arith.addf %209, %208 : vector<2x32xf32>
    %211 = arith.divf %209, %210 : vector<2x32xf32>
    %212 = arith.mulf %203, %178 : vector<2x32xf32>
    %213 = arith.mulf %197, %205 : vector<2x32xf32>
    %214 = arith.addf %212, %213 : vector<2x32xf32>
    %215 = math.tanh %214 : vector<2x32xf32>
    %216 = arith.mulf %211, %215 : vector<2x32xf32>
    %217 = arith.truncf %216 : vector<2x32xf32> to vector<2x32xbf16>
    %218 = arith.index_cast %c5_i32 : i32 to index
    %c0_52 = arith.constant 0 : index
    %c0_53 = arith.constant 0 : index
    %219 = vector.load %arg5[%218, %c0_52, %c0_53] : memref<8x2x32xbf16, #tpu.memory_space<vmem>>, vector<1x2x32xbf16>
    %220 = vector.shape_cast %219 : vector<1x2x32xbf16> to vector<2x32xbf16>
    %221 = vector.shape_cast %217 : vector<2x32xbf16> to vector<1x2x32xbf16>
    tpu.vector_store %arg5[%218, %c0_52, %c0_53], %221 {strides = array<i32>} : memref<8x2x32xbf16, #tpu.memory_space<vmem>>, vector<1x2x32xbf16>,
    %c6_i32 = arith.constant 6 : i32
    %222 = arith.index_cast %c6_i32 : i32 to index
    %c0_54 = arith.constant 0 : index
    %c0_55 = arith.constant 0 : index
    %223 = vector.load %arg1[%222, %c0_54, %c0_55] : memref<8x2x128xf32, #tpu.memory_space<vmem>>, vector<1x2x128xf32>
    %224 = vector.shape_cast %223 : vector<1x2x128xf32> to vector<2x128xf32>
    %225 = arith.truncf %216 : vector<2x32xf32> to vector<2x32xbf16>
    %cst_56 = arith.constant dense<0.000000e+00> : vector<2x128xf32>
    %226 = tpu.matmul %225, %3, %cst_56 {dimension_numbers = #tpu.dot_dimension_numbers<[1], [0], [0], [1], [0, 0, 1, 1], [], []>} : vector<2x32xbf16>, vector<32x128xbf16>, vector<2x128xf32> -> vector<2x128xf32>
    %227 = arith.addf %224, %226 : vector<2x128xf32>
    %228 = vector.extract_strided_slice %227 {offsets = [0, 0], sizes = [2, 32], strides = [1, 1]} : vector<2x128xf32> to vector<2x32xf32>
    %229 = arith.negf %228 : vector<2x32xf32>
    %230 = math.exp %229 : vector<2x32xf32>
    %cst_57 = arith.constant 1.000000e+00 : f32
    %231 = vector.broadcast %cst_57 : f32 to vector<2x32xf32>
    %232 = arith.addf %231, %230 : vector<2x32xf32>
    %233 = arith.divf %231, %232 : vector<2x32xf32>
    %234 = vector.extract_strided_slice %227 {offsets = [0, 32], sizes = [2, 32], strides = [1, 1]} : vector<2x128xf32> to vector<2x32xf32>
    %235 = arith.negf %234 : vector<2x32xf32>
    %236 = math.exp %235 : vector<2x32xf32>
    %cst_58 = arith.constant 1.000000e+00 : f32
    %237 = vector.broadcast %cst_58 : f32 to vector<2x32xf32>
    %238 = arith.addf %237, %236 : vector<2x32xf32>
    %239 = arith.divf %237, %238 : vector<2x32xf32>
    %240 = vector.extract_strided_slice %227 {offsets = [0, 64], sizes = [2, 32], strides = [1, 1]} : vector<2x128xf32> to vector<2x32xf32>
    %241 = math.tanh %240 : vector<2x32xf32>
    %242 = vector.extract_strided_slice %227 {offsets = [0, 96], sizes = [2, 32], strides = [1, 1]} : vector<2x128xf32> to vector<2x32xf32>
    %243 = arith.negf %242 : vector<2x32xf32>
    %244 = math.exp %243 : vector<2x32xf32>
    %cst_59 = arith.constant 1.000000e+00 : f32
    %245 = vector.broadcast %cst_59 : f32 to vector<2x32xf32>
    %246 = arith.addf %245, %244 : vector<2x32xf32>
    %247 = arith.divf %245, %246 : vector<2x32xf32>
    %248 = arith.mulf %239, %214 : vector<2x32xf32>
    %249 = arith.mulf %233, %241 : vector<2x32xf32>
    %250 = arith.addf %248, %249 : vector<2x32xf32>
    %251 = math.tanh %250 : vector<2x32xf32>
    %252 = arith.mulf %247, %251 : vector<2x32xf32>
    %253 = arith.truncf %252 : vector<2x32xf32> to vector<2x32xbf16>
    %254 = arith.index_cast %c6_i32 : i32 to index
    %c0_60 = arith.constant 0 : index
    %c0_61 = arith.constant 0 : index
    %255 = vector.load %arg5[%254, %c0_60, %c0_61] : memref<8x2x32xbf16, #tpu.memory_space<vmem>>, vector<1x2x32xbf16>
    %256 = vector.shape_cast %255 : vector<1x2x32xbf16> to vector<2x32xbf16>
    %257 = vector.shape_cast %253 : vector<2x32xbf16> to vector<1x2x32xbf16>
    tpu.vector_store %arg5[%254, %c0_60, %c0_61], %257 {strides = array<i32>} : memref<8x2x32xbf16, #tpu.memory_space<vmem>>, vector<1x2x32xbf16>,
    %c7_i32 = arith.constant 7 : i32
    %258 = arith.index_cast %c7_i32 : i32 to index
    %c0_62 = arith.constant 0 : index
    %c0_63 = arith.constant 0 : index
    %259 = vector.load %arg1[%258, %c0_62, %c0_63] : memref<8x2x128xf32, #tpu.memory_space<vmem>>, vector<1x2x128xf32>
    %260 = vector.shape_cast %259 : vector<1x2x128xf32> to vector<2x128xf32>
    %261 = arith.truncf %252 : vector<2x32xf32> to vector<2x32xbf16>
    %cst_64 = arith.constant dense<0.000000e+00> : vector<2x128xf32>
    %262 = tpu.matmul %261, %3, %cst_64 {dimension_numbers = #tpu.dot_dimension_numbers<[1], [0], [0], [1], [0, 0, 1, 1], [], []>} : vector<2x32xbf16>, vector<32x128xbf16>, vector<2x128xf32> -> vector<2x128xf32>
    %263 = arith.addf %260, %262 : vector<2x128xf32>
    %264 = vector.extract_strided_slice %263 {offsets = [0, 0], sizes = [2, 32], strides = [1, 1]} : vector<2x128xf32> to vector<2x32xf32>
    %265 = arith.negf %264 : vector<2x32xf32>
    %266 = math.exp %265 : vector<2x32xf32>
    %cst_65 = arith.constant 1.000000e+00 : f32
    %267 = vector.broadcast %cst_65 : f32 to vector<2x32xf32>
    %268 = arith.addf %267, %266 : vector<2x32xf32>
    %269 = arith.divf %267, %268 : vector<2x32xf32>
    %270 = vector.extract_strided_slice %263 {offsets = [0, 32], sizes = [2, 32], strides = [1, 1]} : vector<2x128xf32> to vector<2x32xf32>
    %271 = arith.negf %270 : vector<2x32xf32>
    %272 = math.exp %271 : vector<2x32xf32>
    %cst_66 = arith.constant 1.000000e+00 : f32
    %273 = vector.broadcast %cst_66 : f32 to vector<2x32xf32>
    %274 = arith.addf %273, %272 : vector<2x32xf32>
    %275 = arith.divf %273, %274 : vector<2x32xf32>
    %276 = vector.extract_strided_slice %263 {offsets = [0, 64], sizes = [2, 32], strides = [1, 1]} : vector<2x128xf32> to vector<2x32xf32>
    %277 = math.tanh %276 : vector<2x32xf32>
    %278 = vector.extract_strided_slice %263 {offsets = [0, 96], sizes = [2, 32], strides = [1, 1]} : vector<2x128xf32> to vector<2x32xf32>
    %279 = arith.negf %278 : vector<2x32xf32>
    %280 = math.exp %279 : vector<2x32xf32>
    %cst_67 = arith.constant 1.000000e+00 : f32
    %281 = vector.broadcast %cst_67 : f32 to vector<2x32xf32>
    %282 = arith.addf %281, %280 : vector<2x32xf32>
    %283 = arith.divf %281, %282 : vector<2x32xf32>
    %284 = arith.mulf %275, %250 : vector<2x32xf32>
    %285 = arith.mulf %269, %277 : vector<2x32xf32>
    %286 = arith.addf %284, %285 : vector<2x32xf32>
    %287 = math.tanh %286 : vector<2x32xf32>
    %288 = arith.mulf %283, %287 : vector<2x32xf32>
    %289 = arith.truncf %288 : vector<2x32xf32> to vector<2x32xbf16>
    %290 = arith.index_cast %c7_i32 : i32 to index
    %c0_68 = arith.constant 0 : index
    %c0_69 = arith.constant 0 : index
    %291 = vector.load %arg5[%290, %c0_68, %c0_69] : memref<8x2x32xbf16, #tpu.memory_space<vmem>>, vector<1x2x32xbf16>
    %292 = vector.shape_cast %291 : vector<1x2x32xbf16> to vector<2x32xbf16>
    %293 = vector.shape_cast %289 : vector<2x32xbf16> to vector<1x2x32xbf16>
    tpu.vector_store %arg5[%290, %c0_68, %c0_69], %293 {strides = array<i32>} : memref<8x2x32xbf16, #tpu.memory_space<vmem>>, vector<1x2x32xbf16>,
    %c8_i32 = arith.constant 8 : i32
    %c0_70 = arith.constant 0 : index
    %c0_71 = arith.constant 0 : index
    %294 = vector.load %arg8[%c0_70, %c0_71] : memref<2x32xf32, #tpu.memory_space<vmem>>, vector<2x32xf32>
    tpu.vector_store %arg8[%c0_70, %c0_71], %288 {strides = array<i32>} : memref<2x32xf32, #tpu.memory_space<vmem>>, vector<2x32xf32>,
    %c0_72 = arith.constant 0 : index
    %c0_73 = arith.constant 0 : index
    %295 = vector.load %arg9[%c0_72, %c0_73] : memref<2x32xf32, #tpu.memory_space<vmem>>, vector<2x32xf32>
    tpu.vector_store %arg9[%c0_72, %c0_73], %286 {strides = array<i32>} : memref<2x32xf32, #tpu.memory_space<vmem>>, vector<2x32xf32>,
    %c0_i32_74 = arith.constant 0 : i32
    %296 = arith.cmpi eq, %arg0, %c0_i32_74 : i32
    %297 = arith.extui %296 : i1 to i32
    %c0_i32_75 = arith.constant 0 : i32
    %298 = arith.cmpi ne, %297, %c0_i32_75 : i32
    scf.if %298 {
      %c0_76 = arith.constant 0 : index
      %c0_77 = arith.constant 0 : index
      %299 = vector.load %arg6[%c0_76, %c0_77] : memref<2x32xf32, #tpu.memory_space<vmem>>, vector<2x32xf32>
      tpu.vector_store %arg6[%c0_76, %c0_77], %288 {strides = array<i32>} : memref<2x32xf32, #tpu.memory_space<vmem>>, vector<2x32xf32>,
      %c0_78 = arith.constant 0 : index
      %c0_79 = arith.constant 0 : index
      %300 = vector.load %arg7[%c0_78, %c0_79] : memref<2x32xf32, #tpu.memory_space<vmem>>, vector<2x32xf32>
      tpu.vector_store %arg7[%c0_78, %c0_79], %286 {strides = array<i32>} : memref<2x32xf32, #tpu.memory_space<vmem>>, vector<2x32xf32>,
    } else {
    }
    return
  }
  func.func @transform_0(%arg0: i32) -> (i32, i32, i32) {
    %c0_i32 = arith.constant 0 : i32
    %c0_i32_0 = arith.constant 0 : i32
    %c0_i32_1 = arith.constant 0 : i32
    return %arg0, %c0_i32, %c0_i32_0 : i32, i32, i32
  }
  func.func @transform_1(%arg0: i32) -> (i32, i32) {
    %c0_i32 = arith.constant 0 : i32
    %c0_i32_0 = arith.constant 0 : i32
    %c0_i32_1 = arith.constant 0 : i32
    return %c0_i32, %c0_i32_0 : i32, i32
  }
  func.func @transform_2(%arg0: i32) -> (i32, i32) {
    %c0_i32 = arith.constant 0 : i32
    %c0_i32_0 = arith.constant 0 : i32
    %c0_i32_1 = arith.constant 0 : i32
    return %c0_i32, %c0_i32_0 : i32, i32
  }
  func.func @transform_3(%arg0: i32) -> (i32, i32) {
    %c0_i32 = arith.constant 0 : i32
    %c0_i32_0 = arith.constant 0 : i32
    %c0_i32_1 = arith.constant 0 : i32
    return %c0_i32, %c0_i32_0 : i32, i32
  }
  func.func @transform_4(%arg0: i32) -> (i32, i32, i32) {
    %c0_i32 = arith.constant 0 : i32
    %c0_i32_0 = arith.constant 0 : i32
    %c0_i32_1 = arith.constant 0 : i32
    return %arg0, %c0_i32, %c0_i32_0 : i32, i32, i32
  }
  func.func @transform_5(%arg0: i32) -> (i32, i32) {
    %c0_i32 = arith.constant 0 : i32
    %c0_i32_0 = arith.constant 0 : i32
    %c0_i32_1 = arith.constant 0 : i32
    return %c0_i32, %c0_i32_0 : i32, i32
  }
  func.func @transform_6(%arg0: i32) -> (i32, i32) {
    %c0_i32 = arith.constant 0 : i32
    %c0_i32_0 = arith.constant 0 : i32
    %c0_i32_1 = arith.constant 0 : i32
    return %c0_i32, %c0_i32_0 : i32, i32
  }
}

</mosaic_0001>

<bundles_post_ra>
// kernel: rnn_model_forward.5
= control target key start
LH: loop header
LB: loop body
LE: loop exit
PB: predicated region body
PF: predicated region fallthrough
CT: control target
= control target key end

     0   :  { %vm42_vm0 = vcmask 261120   ;;  %s121_s1 = inlined_call_operand.vmem [shape: bf16[32,128], index: 1, kind: input, shape index: {}]   ;;  %s122_s2 = inlined_call_operand.vmem [shape: f32[1,128], index: 2, kind: input, shape index: {}]   ;;  %s123_s0 = inlined_call_operand.vmem [shape: bf16[16,32], index: 0, kind: input, shape index: {}]   ;;  %s124_s3 = inlined_call_operand.vmem [shape: f32[16,128], index: 3, kind: output, shape index: {}]  }
   0x1   :  { %v81_v0 = vld [vmem:[%s121_s1 + $0x8] sm:$0xff]  ;;  %v80_v1 = vld [vmem:[%s121_s1] sm:$0xff] }
   0x2   :  { %52 = vmatpush.bf16.msra.mxu0 %v81_v0  ;;  %v79_v2 = vld [vmem:[%s123_s0] sm:$0xff] }
   0x3   :  { %v82_v3 = vld [vmem:[%s122_s2] ss:$0 sm:$0xff] }
   0x6   :  { %53 = vmatpush.bf16.msra.mxu0 %v80_v1 }
   0x9   :  { %78 = vmatmul.msk.bf16.vlgmr.msra.gmra.mxu0 %vm42_vm0, %v79_v2 }
  0x86   :  { %v55_v4 = vpop.f32.mrf.mxu0 }
  0x87   :  { %v56_v5 = vadd.f32 %v82_v3, %v55_v4 }
  0x89   :  { %60 = vst [vmem:[%s124_s3] sm:$0xff] %v56_v5 }
  0x8e   :  { %v57_v6 = vpop.f32.mrf.mxu0 }
  0x8f   :  { %v58_v7 = vadd.f32 %v82_v3, %v57_v6 }
  0x91   :  { %61 = vst [vmem:[%s124_s3 + $0x8] sm:$0xff] %v58_v7 }

// kernel: rnn_model_forward.9
= control target key start
LH: loop header
LB: loop body
LE: loop exit
PB: predicated region body
PF: predicated region fallthrough
CT: control target
= control target key end

     0   :  { %s165_s0 = inlined_call_operand.vmem [shape: bf16[16,32], index: 0, kind: input, shape index: {}]   ;;  %s166_s1 = inlined_call_operand.vmem [shape: bf16[32,128], index: 1, kind: input, shape index: {}]   ;;  %s167_s2 = inlined_call_operand.vmem [shape: f32[1,128], index: 2, kind: input, shape index: {}]   ;;  %s168_s3 = inlined_call_operand.hbm [shape: f32[16,128], index: 3, kind: output, shape index: {}]  }
   0x1   :  { %v96_v0 = vld [vmem:[%s166_s1 + $0x8] sm:$0xff] }
   0x2   :  { %8 = vsyncpa [#allocation3], 0  ;;  %53 = vmatpush.bf16.msra.mxu0 %v96_v0  ;;  %v95_v1 = vld [vmem:[%s166_s1] sm:$0xff]  ;;  %vm43_vm0 = vcmask 261120   ;;  %s127_s20 = smov [#allocation2]   ;;  %s69_s1 = sshll.u32 %s168_s3, 4  ;;  %s70_s1 = int_to_ptr.hbm [resolvable:$true] %s69_s1 }
   0x3   :  { %v94_v2 = vld [vmem:[%s165_s0] sm:$0xff]  ;;  %s67_s21 = sshll.u32 %s127_s20, 4  ;;  %s128_s0 = smov 128   ;;  %s68_s21 = int_to_ptr.vmem [resolvable:$true] %s67_s21 }
   0x4   :  { %v100_v3 = vld [vmem:[%s167_s2] ss:$0 sm:$0xff]  ;;  %s129_s24 = smov 8  }
   0x6   :  { %54 = vmatpush.bf16.msra.mxu0 %v95_v1 }
   0x9   :  { %93 = vmatmul.msk.bf16.vlgmr.msra.gmra.mxu0 %vm43_vm0, %v94_v2 }
  0x86   :  { %v56_v4 = vpop.f32.mrf.mxu0 }
  0x87   :  { %v57_v5 = vadd.f32 %v100_v3, %v56_v4 }
  0x89   :  { %61 = vst [vmem:[#allocation2] sm:$0xff] %v57_v5 }
  0x8e   :  { %v58_v6 = vpop.f32.mrf.mxu0 }
  0x8f   :  { %v59_v7 = vadd.f32 %v100_v3, %v58_v6 }
  0x91   :  { %62 = vst [vmem:[#allocation2 + $0x8] sm:$0xff] %v59_v7 }
  0x92   :  { %75 = dma.vmem_to_hbm [thread:$0]  %s68_s21, 256, %s70_s1, [#allocation3], %s128_s0, %s128_s0, %s129_s24  }
  0x93   :  { %125 = dma.done.wait [#allocation3], 256  }
  0x94   :  { %126 = vsyncadd [#allocation3], 4294967040 }
  0x95   :  { %80 = vsyncpa [#allocation3], 1 }

// kernel: rnn_model_forward.6
= control target key start
LH: loop header
LB: loop body
LE: loop exit
PB: predicated region body
PF: predicated region fallthrough
CT: control target
= control target key end

     0   :  { %vm26_vm0 = vcmask 254976   ;;  %vm50_vm1 = vcmask 261120   ;;  %s761_s29 = smov 64   ;;  %s762_s30 = smov 32   ;;  %s970_s1 = inlined_call_operand.vmem [shape: bf16[32,128], index: 1, kind: input, shape index: {}]   ;;  %s971_s2 = inlined_call_operand.vmem [shape: f32[2,32], index: 2, kind: input, shape index: {}]   ;;  %s972_s3 = inlined_call_operand.vmem [shape: f32[2,32], index: 3, kind: input, shape index: {}]   ;;  %s973_s0 = inlined_call_operand.vmem [shape: f32[8,2,128], index: 0, kind: input, shape index: {}]   ;;  %s974_s4 = inlined_call_operand.vmem [shape: bf16[8,2,32], index: 4, kind: output, shape index: {0}]   ;;  %s975_s6 = inlined_call_operand.vmem [shape: f32[2,32], index: 6, kind: output, shape index: {2}]   ;;  %s976_s5 = inlined_call_operand.vmem [shape: f32[2,32], index: 5, kind: output, shape index: {1}]  }
   0x1   :  { %v693_v0 = vld [vmem:[%s970_s1 + $0x8] sm:$0xff]  ;;  %v25_v1 = vld [vmem:[%s971_s2] sm:$0x3]  ;;  %v664_v38 = vld [vmem:[%s973_s0 + $0x2] sm:$0x3]  ;;  %s763_s25 = smov 96  }
   0x2   :  { %27 = vst.msk [vmem:[#allocation2] sm:$0x3] %vm26_vm0, %v25_v1  ;;  %60 = vmatpush.bf16.msra.mxu0 %v693_v0  ;;  %v692_v2 = vld [vmem:[%s970_s1] sm:$0xff]  ;;  %137 = vmatpush.bf16.msra.mxu1 %v693_v0 }
   0x3   :  { %209 = vmatpush.bf16.msra.mxu2 %v693_v0  ;;  %281 = vmatpush.bf16.msra.mxu3 %v693_v0  ;;  %v28_v5 = vld [vmem:[%s972_s3] sm:$0x3] }
   0x4   :  { %29 = vst.msk [vmem:[#allocation3] sm:$0x3] %vm26_vm0, %v28_v5  ;;  %v36_v6 = vld [vmem:[%s973_s0] sm:$0x3] }
   0x6   :  { %61 = vmatpush.bf16.msra.mxu0 %v692_v2  ;;  %138 = vmatpush.bf16.msra.mxu1 %v692_v2 }
   0x7   :  { %210 = vmatpush.bf16.msra.mxu2 %v692_v2  ;;  %282 = vmatpush.bf16.msra.mxu3 %v692_v2 }
   0x9   :  { %v34_v3 = vld [vmem:[#allocation2] sm:$0x3] }
   0xa   :  { %353 = vmatpush.bf16.msrb.mxu0 %v693_v0  ;;  %425 = vmatpush.bf16.msrb.mxu1 %v693_v0  ;;  %v37_v4 = vpack.c.bf16 %v34_v3, %v34_v3 }
   0xb   :  { %497 = vmatpush.bf16.msrb.mxu2 %v693_v0  ;;  %569 = vmatpush.bf16.msrb.mxu3 %v693_v0  ;;  %v35_v11 = vld [vmem:[#allocation3] sm:$0x3] }
   0xc   :  { %662 = vmatmul.msk.bf16.vlgmr.msra.gmra.mxu0 %vm50_vm1, %v37_v4  ;;  %v668_v4 = vld [vmem:[%s973_s0 + $0x4] sm:$0x3] }
   0xe   :  { %354 = vmatpush.bf16.msrb.mxu0 %v692_v2  ;;  %426 = vmatpush.bf16.msrb.mxu1 %v692_v2 }
   0xf   :  { %498 = vmatpush.bf16.msrb.mxu2 %v692_v2  ;;  %570 = vmatpush.bf16.msrb.mxu3 %v692_v2 }
  0x89   :  { %v63_v7 = vpop.f32.mrf.mxu0 }
  0x8a   :  { %v67_v8 = vadd.f32 %v63_v7, %v36_v6 }
  0x8c   :  { %697 = vtanh.f32 %v67_v8  ;;  %v663_v12 = vmul.f32 -1.442695, %v67_v8 }
  0x8e   :  { %699 = vpow2.f32 %v663_v12 }
  0x91   :  { %v65_v9 = vpop.f32.mrf.mxu0 }
  0x92   :  { %v698_v10 = vpop.eup %697 }
  0x93   :  { %94 = vrot.lane.b32.xlu0 %v698_v10, %s761_s29 }
  0x94   :  { %v700_v13 = vpop.eup %699 }
  0x95   :  { %v71_v14 = vadd.f32 1.0, %v700_v13 }
  0x97   :  { %701 = vrcp.f32 %v71_v14  ;;  %v83_v20 = vand.u32 2147483648, %v71_v14  ;;  %vm77_vm3 = vweird.f32 %v71_v14  ;;  %v81_v21 = vand.u32 2147483647, %v71_v14 }
  0x99   :  { %v84_v23 = vor.u32 1.1754944e-38, %v83_v20  ;;  %vm82_vm5 = vcmp.eq.f32.partialorder %v81_v21, 8.507059e+37 }
  0x9b   :  { %89 = vrot.lane.b32.xlu0 %v35_v11, %s762_s30 }
  0x9d   :  { %v702_v15 = vpop.eup %701 }
  0x9e   :  { %v73_v16 = vmul.f32 %v702_v15, %v71_v14  ;;  %vm78_vm2 = vweird.f32 %v702_v15 }
  0x9f   :  { %vm79_vm4 = vmor %vm77_vm3, %vm78_vm2 }
  0xa0   :  { %v74_v17 = vsub.f32 1.0, %v73_v16 }
  0xa2   :  { %v75_v18 = vmul.f32 %v702_v15, %v74_v17 }
  0xa4   :  { %v76_v19 = vadd.f32 %v702_v15, %v75_v18 }
  0xa6   :  { %v80_v22 = vsel %vm79_vm4, %v702_v15, %v76_v19 }
  0xa7   :  { %v85_v25 = vsel %vm82_vm5, %v84_v23, %v80_v22 }
 0x105   :  { %v95_v24 = vpop.permute.xlu0 %94 }
 0x106   :  { %v97_v26 = vmul.f32 %v95_v24, %v85_v25 }
 0x108   :  { %99 = vrot.lane.b32.xlu1 %v97_v26, %s762_s30 }
 0x10d   :  { %v90_v27 = vpop.permute.xlu0 %89 }
 0x10e   :  { %v92_v28 = vmul.f32 %v90_v27, %v85_v25 }
 0x17a   :  { %v100_v29 = vpop.permute.xlu1 %99 }
 0x17b   :  { %v102_v30 = vadd.f32 %v100_v29, %v92_v28 }
 0x17d   :  { %703 = vtanh.f32 %v102_v30 }
 0x183   :  { %v704_v31 = vpop.eup %703 }
 0x184   :  { %105 = vrot.lane.b32.xlu1 %v704_v31, %s761_s29 }
 0x1f6   :  { %v106_v32 = vpop.permute.xlu1 %105 }
 0x1f7   :  { %v108_v33 = vmul.f32 %v106_v32, %v85_v25 }
 0x1f9   :  { %v821_v34 = vpack.c.bf16 %v108_v33, %v108_v33 }
 0x1fb   :  { %v124_v35 = vunpack.c.l.b16 %v821_v34 }
 0x1fd   :  { %v125_v36 = vpack.c.b16 %v124_v35, %v124_v35  ;;  %v672_v35 = vld [vmem:[%s973_s0 + $0x6] sm:$0x3] }
 0x1ff   :  { %126 = vrot.lane.b32.xlu2 %v125_v36, %s762_s30 }
 0x259   :  { %v127_v37 = vpop.permute.xlu2 %126 }
 0x25a   :  { %665 = vmatmul.msk.bf16.vlgmr.msra.gmra.mxu1 %vm50_vm1, %v127_v37 }
 0x2d7   :  { %v140_v39 = vpop.f32.mrf.mxu1 }
 0x2d8   :  { %v144_v40 = vadd.f32 %v664_v38, %v140_v39 }
 0x2da   :  { %705 = vtanh.f32 %v144_v40  ;;  %v666_v43 = vmul.f32 -1.442695, %v144_v40 }
 0x2dc   :  { %707 = vpow2.f32 %v666_v43 }
 0x2df   :  { %v142_v41 = vpop.f32.mrf.mxu1 }
 0x2e0   :  { %v706_v42 = vpop.eup %705 }
 0x2e1   :  { %167 = vrot.lane.b32.xlu2 %v706_v42, %s761_s29 }
 0x2e2   :  { %v708_v44 = vpop.eup %707 }
 0x2e3   :  { %v148_v45 = vadd.f32 1.0, %v708_v44 }
 0x2e5   :  { %709 = vrcp.f32 %v148_v45  ;;  %v160_v51 = vand.u32 2147483648, %v148_v45  ;;  %vm154_vm7 = vweird.f32 %v148_v45  ;;  %v158_v52 = vand.u32 2147483647, %v148_v45 }
 0x2e7   :  { %v161_v54 = vor.u32 1.1754944e-38, %v160_v51  ;;  %vm159_vm9 = vcmp.eq.f32.partialorder %v158_v52, 8.507059e+37 }
 0x2eb   :  { %v710_v46 = vpop.eup %709 }
 0x2ec   :  { %v150_v47 = vmul.f32 %v710_v46, %v148_v45  ;;  %vm155_vm6 = vweird.f32 %v710_v46 }
 0x2ed   :  { %vm156_vm8 = vmor %vm154_vm7, %vm155_vm6 }
 0x2ee   :  { %v151_v48 = vsub.f32 1.0, %v150_v47 }
 0x2f0   :  { %v152_v49 = vmul.f32 %v710_v46, %v151_v48 }
 0x2f2   :  { %v153_v50 = vadd.f32 %v710_v46, %v152_v49 }
 0x2f4   :  { %v157_v53 = vsel %vm156_vm8, %v710_v46, %v153_v50 }
 0x2f5   :  { %v162_v56 = vsel %vm159_vm9, %v161_v54, %v157_v53 }
 0x2f6   :  { %v165_v58 = vmul.f32 %v162_v56, %v102_v30 }
 0x33b   :  { %v168_v55 = vpop.permute.xlu2 %167 }
 0x33c   :  { %v170_v57 = vmul.f32 %v168_v55, %v162_v56 }
 0x33e   :  { %172 = vrot.lane.b32.xlu0 %v170_v57, %s762_s30 }
 0x3b0   :  { %v173_v59 = vpop.permute.xlu0 %172 }
 0x3b1   :  { %v175_v60 = vadd.f32 %v173_v59, %v165_v58 }
 0x3b3   :  { %711 = vtanh.f32 %v175_v60 }
 0x3b9   :  { %v712_v61 = vpop.eup %711 }
 0x3ba   :  { %178 = vrot.lane.b32.xlu1 %v712_v61, %s761_s29 }
 0x42c   :  { %v179_v62 = vpop.permute.xlu1 %178 }
 0x42d   :  { %v181_v63 = vmul.f32 %v179_v62, %v162_v56 }
 0x42f   :  { %v832_v0 = vpack.c.bf16 %v181_v63, %v181_v63 }
 0x431   :  { %v196_v1 = vunpack.c.l.b16 %v832_v0 }
 0x433   :  { %v197_v2 = vpack.c.b16 %v196_v1, %v196_v1 }
 0x435   :  { %198 = vrot.lane.b32.xlu2 %v197_v2, %s762_s30  ;;  %v676_v2 = vld [vmem:[%s973_s0 + $0x8] sm:$0x3] }
 0x48f   :  { %v199_v3 = vpop.permute.xlu2 %198 }
 0x490   :  { %669 = vmatmul.msk.bf16.vlgmr.msra.gmra.mxu2 %vm50_vm1, %v199_v3 }
 0x513   :  { %v212_v5 = vpop.f32.mrf.mxu2 }
 0x514   :  { %v216_v6 = vadd.f32 %v668_v4, %v212_v5 }
 0x516   :  { %713 = vtanh.f32 %v216_v6  ;;  %v670_v9 = vmul.f32 -1.442695, %v216_v6 }
 0x518   :  { %715 = vpow2.f32 %v670_v9 }
 0x51b   :  { %v214_v7 = vpop.f32.mrf.mxu2 }
 0x51c   :  { %v714_v8 = vpop.eup %713 }
 0x51d   :  { %239 = vrot.lane.b32.xlu0 %v714_v8, %s761_s29 }
 0x51e   :  { %v716_v10 = vpop.eup %715 }
 0x51f   :  { %v220_v11 = vadd.f32 1.0, %v716_v10 }
 0x521   :  { %717 = vrcp.f32 %v220_v11  ;;  %v232_v17 = vand.u32 2147483648, %v220_v11  ;;  %vm226_vm11 = vweird.f32 %v220_v11  ;;  %v230_v18 = vand.u32 2147483647, %v220_v11 }
 0x523   :  { %v233_v20 = vor.u32 1.1754944e-38, %v232_v17  ;;  %vm231_vm13 = vcmp.eq.f32.partialorder %v230_v18, 8.507059e+37 }
 0x527   :  { %v718_v12 = vpop.eup %717 }
 0x528   :  { %v222_v13 = vmul.f32 %v718_v12, %v220_v11  ;;  %vm227_vm10 = vweird.f32 %v718_v12 }
 0x529   :  { %vm228_vm12 = vmor %vm226_vm11, %vm227_vm10 }
 0x52a   :  { %v223_v14 = vsub.f32 1.0, %v222_v13 }
 0x52c   :  { %v224_v15 = vmul.f32 %v718_v12, %v223_v14 }
 0x52e   :  { %v225_v16 = vadd.f32 %v718_v12, %v224_v15 }
 0x530   :  { %v229_v19 = vsel %vm228_vm12, %v718_v12, %v225_v16 }
 0x531   :  { %v234_v22 = vsel %vm231_vm13, %v233_v20, %v229_v19 }
 0x532   :  { %v237_v24 = vmul.f32 %v234_v22, %v175_v60 }
 0x58f   :  { %v240_v21 = vpop.permute.xlu0 %239 }
 0x590   :  { %v242_v23 = vmul.f32 %v240_v21, %v234_v22 }
 0x592   :  { %244 = vrot.lane.b32.xlu1 %v242_v23, %s762_s30 }
 0x604   :  { %v245_v25 = vpop.permute.xlu1 %244 }
 0x605   :  { %v247_v26 = vadd.f32 %v245_v25, %v237_v24 }
 0x607   :  { %719 = vtanh.f32 %v247_v26 }
 0x60d   :  { %v720_v27 = vpop.eup %719 }
 0x60e   :  { %250 = vrot.lane.b32.xlu2 %v720_v27, %s761_s29 }
 0x668   :  { %v251_v28 = vpop.permute.xlu2 %250 }
 0x669   :  { %v253_v29 = vmul.f32 %v251_v28, %v234_v22 }
 0x66b   :  { %v843_v30 = vpack.c.bf16 %v253_v29, %v253_v29 }
 0x66d   :  { %v268_v31 = vunpack.c.l.b16 %v843_v30 }
 0x66f   :  { %v269_v32 = vpack.c.b16 %v268_v31, %v268_v31 }
 0x671   :  { %270 = vrot.lane.b32.xlu0 %v269_v32, %s762_s30 }
 0x6e3   :  { %v271_v33 = vpop.permute.xlu0 %270 }
 0x6e4   :  { %673 = vmatmul.msk.bf16.vlgmr.msra.gmra.mxu3 %vm50_vm1, %v271_v33  ;;  %v680_v33 = vld [vmem:[%s973_s0 + $0xa] sm:$0x3] }
 0x767   :  { %v284_v36 = vpop.f32.mrf.mxu3 }
 0x768   :  { %v288_v37 = vadd.f32 %v672_v35, %v284_v36 }
 0x76a   :  { %721 = vtanh.f32 %v288_v37  ;;  %v674_v40 = vmul.f32 -1.442695, %v288_v37 }
 0x76c   :  { %723 = vpow2.f32 %v674_v40 }
 0x76f   :  { %v286_v38 = vpop.f32.mrf.mxu3 }
 0x770   :  { %v722_v39 = vpop.eup %721 }
 0x771   :  { %311 = vrot.lane.b32.xlu1 %v722_v39, %s761_s29 }
 0x772   :  { %v724_v41 = vpop.eup %723 }
 0x773   :  { %v292_v42 = vadd.f32 1.0, %v724_v41 }
 0x775   :  { %725 = vrcp.f32 %v292_v42  ;;  %v304_v48 = vand.u32 2147483648, %v292_v42  ;;  %vm298_vm15 = vweird.f32 %v292_v42  ;;  %v302_v49 = vand.u32 2147483647, %v292_v42 }
 0x777   :  { %v305_v51 = vor.u32 1.1754944e-38, %v304_v48  ;;  %vm303_vm3 = vcmp.eq.f32.partialorder %v302_v49, 8.507059e+37 }
 0x77b   :  { %v726_v43 = vpop.eup %725 }
 0x77c   :  { %v294_v44 = vmul.f32 %v726_v43, %v292_v42  ;;  %vm299_vm14 = vweird.f32 %v726_v43 }
 0x77d   :  { %vm300_vm2 = vmor %vm298_vm15, %vm299_vm14 }
 0x77e   :  { %v295_v45 = vsub.f32 1.0, %v294_v44 }
 0x780   :  { %v296_v46 = vmul.f32 %v726_v43, %v295_v45 }
 0x782   :  { %v297_v47 = vadd.f32 %v726_v43, %v296_v46 }
 0x784   :  { %v301_v50 = vsel %vm300_vm2, %v726_v43, %v297_v47  ;;  %vm112_vm2 = vcmask 1040384  }
 0x785   :  { %v306_v53 = vsel %vm303_vm3, %v305_v51, %v301_v50 }
 0x786   :  { %v309_v55 = vmul.f32 %v306_v53, %v247_v26 }
 0x7e3   :  { %v312_v52 = vpop.permute.xlu1 %311 }
 0x7e4   :  { %v314_v54 = vmul.f32 %v312_v52, %v306_v53 }
 0x7e6   :  { %316 = vrot.lane.b32.xlu2 %v314_v54, %s762_s30 }
 0x840   :  { %v317_v56 = vpop.permute.xlu2 %316 }
 0x841   :  { %v319_v57 = vadd.f32 %v317_v56, %v309_v55 }
 0x843   :  { %727 = vtanh.f32 %v319_v57 }
 0x849   :  { %v728_v58 = vpop.eup %727 }
 0x84a   :  { %322 = vrot.lane.b32.xlu0 %v728_v58, %s761_s29 }
 0x8bc   :  { %v323_v59 = vpop.permute.xlu0 %322 }
 0x8bd   :  { %v325_v60 = vmul.f32 %v323_v59, %v306_v53 }
 0x8bf   :  { %v854_v61 = vpack.c.bf16 %v325_v60, %v325_v60 }
 0x8c1   :  { %v340_v62 = vunpack.c.l.b16 %v854_v61 }
 0x8c3   :  { %v341_v63 = vpack.c.b16 %v340_v62, %v340_v62 }
 0x8c5   :  { %342 = vrot.lane.b32.xlu1 %v341_v63, %s762_s30 }
 0x937   :  { %v343_v1 = vpop.permute.xlu1 %342 }
 0x938   :  { %677 = vmatmul.msk.bf16.vlgmr.msrb.gmra.mxu0 %vm50_vm1, %v343_v1 }
 0x9b5   :  { %v356_v3 = vpop.f32.mrf.mxu0 }
 0x9b6   :  { %v360_v4 = vadd.f32 %v676_v2, %v356_v3  ;;  %v684_v2 = vld [vmem:[%s973_s0 + $0xc] sm:$0x3] }
 0x9b8   :  { %729 = vtanh.f32 %v360_v4  ;;  %v678_v7 = vmul.f32 -1.442695, %v360_v4 }
 0x9ba   :  { %731 = vpow2.f32 %v678_v7 }
 0x9bd   :  { %v358_v5 = vpop.f32.mrf.mxu0 }
 0x9be   :  { %v730_v6 = vpop.eup %729 }
 0x9bf   :  { %383 = vrot.lane.b32.xlu2 %v730_v6, %s761_s29 }
 0x9c0   :  { %v732_v8 = vpop.eup %731 }
 0x9c1   :  { %v364_v9 = vadd.f32 1.0, %v732_v8 }
 0x9c3   :  { %733 = vrcp.f32 %v364_v9  ;;  %v376_v15 = vand.u32 2147483648, %v364_v9  ;;  %vm370_vm5 = vweird.f32 %v364_v9  ;;  %v374_v16 = vand.u32 2147483647, %v364_v9 }
 0x9c5   :  { %v377_v18 = vor.u32 1.1754944e-38, %v376_v15  ;;  %vm375_vm7 = vcmp.eq.f32.partialorder %v374_v16, 8.507059e+37 }
 0x9c9   :  { %v734_v10 = vpop.eup %733 }
 0x9ca   :  { %v366_v11 = vmul.f32 %v734_v10, %v364_v9  ;;  %vm371_vm4 = vweird.f32 %v734_v10 }
 0x9cb   :  { %vm372_vm6 = vmor %vm370_vm5, %vm371_vm4 }
 0x9cc   :  { %v367_v12 = vsub.f32 1.0, %v366_v11 }
 0x9ce   :  { %v368_v13 = vmul.f32 %v734_v10, %v367_v12 }
 0x9d0   :  { %v369_v14 = vadd.f32 %v734_v10, %v368_v13 }
 0x9d2   :  { %v373_v17 = vsel %vm372_vm6, %v734_v10, %v369_v14  ;;  %vm120_vm6 = vcmask 253952  }
 0x9d3   :  { %v378_v20 = vsel %vm375_vm7, %v377_v18, %v373_v17 }
 0x9d4   :  { %v381_v22 = vmul.f32 %v378_v20, %v319_v57 }
 0xa19   :  { %v384_v19 = vpop.permute.xlu2 %383 }
 0xa1a   :  { %v386_v21 = vmul.f32 %v384_v19, %v378_v20 }
 0xa1c   :  { %388 = vrot.lane.b32.xlu0 %v386_v21, %s762_s30 }
 0xa8e   :  { %v389_v23 = vpop.permute.xlu0 %388 }
 0xa8f   :  { %v391_v24 = vadd.f32 %v389_v23, %v381_v22 }
 0xa91   :  { %735 = vtanh.f32 %v391_v24 }
 0xa97   :  { %v736_v25 = vpop.eup %735 }
 0xa98   :  { %394 = vrot.lane.b32.xlu1 %v736_v25, %s761_s29 }
 0xb0a   :  { %v395_v26 = vpop.permute.xlu1 %394 }
 0xb0b   :  { %v397_v27 = vmul.f32 %v395_v26, %v378_v20 }
 0xb0d   :  { %v865_v28 = vpack.c.bf16 %v397_v27, %v397_v27 }
 0xb0f   :  { %v412_v29 = vunpack.c.l.b16 %v865_v28 }
 0xb11   :  { %v413_v31 = vpack.c.b16 %v412_v29, %v412_v29 }
 0xb13   :  { %414 = vrot.lane.b32.xlu2 %v413_v31, %s762_s30 }
 0xb6d   :  { %v415_v32 = vpop.permute.xlu2 %414 }
 0xb6e   :  { %681 = vmatmul.msk.bf16.vlgmr.msrb.gmra.mxu1 %vm50_vm1, %v415_v32 }
 0xbeb   :  { %v428_v35 = vpop.f32.mrf.mxu1 }
 0xbec   :  { %v432_v36 = vadd.f32 %v680_v33, %v428_v35  ;;  %v688_v35 = vld [vmem:[%s973_s0 + $0xe] sm:$0x3] }
 0xbee   :  { %737 = vtanh.f32 %v432_v36  ;;  %v682_v39 = vmul.f32 -1.442695, %v432_v36 }
 0xbf0   :  { %739 = vpow2.f32 %v682_v39 }
 0xbf3   :  { %v430_v37 = vpop.f32.mrf.mxu1 }
 0xbf4   :  { %v738_v38 = vpop.eup %737 }
 0xbf5   :  { %455 = vrot.lane.b32.xlu0 %v738_v38, %s761_s29 }
 0xbf6   :  { %v740_v40 = vpop.eup %739 }
 0xbf7   :  { %v436_v41 = vadd.f32 1.0, %v740_v40  ;;  %v111_v40 = vrot.slane %v821_v34, 3 }
 0xbf9   :  { %741 = vrcp.f32 %v436_v41  ;;  %v448_v47 = vand.u32 2147483648, %v436_v41  ;;  %vm442_vm9 = vweird.f32 %v436_v41  ;;  %v446_v48 = vand.u32 2147483647, %v436_v41 }
 0xbfb   :  { %v449_v50 = vor.u32 1.1754944e-38, %v448_v47  ;;  %vm447_vm11 = vcmp.eq.f32.partialorder %v446_v48, 8.507059e+37 }
 0xbff   :  { %v742_v42 = vpop.eup %741 }
 0xc00   :  { %v438_v43 = vmul.f32 %v742_v42, %v436_v41  ;;  %vm443_vm8 = vweird.f32 %v742_v42  ;;  %v115_v41 = vsel %vm112_vm2, %v821_v34, %v111_v40 }
 0xc01   :  { %vm444_vm10 = vmor %vm442_vm9, %vm443_vm8 }
 0xc02   :  { %v439_v44 = vsub.f32 1.0, %v438_v43 }
 0xc04   :  { %v440_v45 = vmul.f32 %v742_v42, %v439_v44 }
 0xc06   :  { %v441_v46 = vadd.f32 %v742_v42, %v440_v45 }
 0xc08   :  { %v445_v49 = vsel %vm444_vm10, %v742_v42, %v441_v46  ;;  %v328_v42 = vrot.slane %v854_v61, 3 }
 0xc09   :  { %v450_v52 = vsel %vm447_vm11, %v449_v50, %v445_v49 }
 0xc0a   :  { %v453_v54 = vmul.f32 %v450_v52, %v391_v24  ;;  %v331_v43 = vsel %vm112_vm2, %v854_v61, %v328_v42 }
 0xc67   :  { %v456_v51 = vpop.permute.xlu0 %455 }
 0xc68   :  { %v458_v53 = vmul.f32 %v456_v51, %v450_v52 }
 0xc6a   :  { %460 = vrot.lane.b32.xlu1 %v458_v53, %s762_s30 }
 0xcdc   :  { %v461_v55 = vpop.permute.xlu1 %460 }
 0xcdd   :  { %v463_v56 = vadd.f32 %v461_v55, %v453_v54 }
 0xcdf   :  { %743 = vtanh.f32 %v463_v56 }
 0xce5   :  { %v744_v57 = vpop.eup %743 }
 0xce6   :  { %466 = vrot.lane.b32.xlu2 %v744_v57, %s761_s29 }
 0xd40   :  { %v467_v58 = vpop.permute.xlu2 %466 }
 0xd41   :  { %v469_v59 = vmul.f32 %v467_v58, %v450_v52 }
 0xd43   :  { %v876_v60 = vpack.c.bf16 %v469_v59, %v469_v59  ;;  %v184_v59 = vrot.slane %v832_v0, 3 }
 0xd45   :  { %v484_v62 = vunpack.c.l.b16 %v876_v60 }
 0xd47   :  { %v485_v63 = vpack.c.b16 %v484_v62, %v484_v62 }
 0xd49   :  { %486 = vrot.lane.b32.xlu0 %v485_v63, %s762_s30  ;;  %v187_v63 = vsel %vm112_vm2, %v832_v0, %v184_v59 }
 0xdbb   :  { %v487_v1 = vpop.permute.xlu0 %486 }
 0xdbc   :  { %685 = vmatmul.msk.bf16.vlgmr.msrb.gmra.mxu2 %vm50_vm1, %v487_v1  ;;  %v400_v1 = vrot.slane %v865_v28, 3 }
 0xe3f   :  { %v500_v3 = vpop.f32.mrf.mxu2 }
 0xe40   :  { %v504_v4 = vadd.f32 %v684_v2, %v500_v3  ;;  %v403_v3 = vsel %vm112_vm2, %v865_v28, %v400_v1  ;;  %v256_v28 = vrot.slane %v843_v30, 3 }
 0xe42   :  { %745 = vtanh.f32 %v504_v4  ;;  %v686_v7 = vmul.f32 -1.442695, %v504_v4 }
 0xe44   :  { %747 = vpow2.f32 %v686_v7 }
 0xe47   :  { %v502_v5 = vpop.f32.mrf.mxu2 }
 0xe48   :  { %v746_v6 = vpop.eup %745 }
 0xe49   :  { %527 = vrot.lane.b32.xlu1 %v746_v6, %s761_s29 }
 0xe4a   :  { %v748_v8 = vpop.eup %747 }
 0xe4b   :  { %v508_v9 = vadd.f32 1.0, %v748_v8 }
 0xe4d   :  { %749 = vrcp.f32 %v508_v9  ;;  %v520_v15 = vand.u32 2147483648, %v508_v9  ;;  %vm514_vm13 = vweird.f32 %v508_v9  ;;  %v518_v16 = vand.u32 2147483647, %v508_v9 }
 0xe4f   :  { %v521_v18 = vor.u32 1.1754944e-38, %v520_v15  ;;  %vm519_vm15 = vcmp.eq.f32.partialorder %v518_v16, 8.507059e+37 }
 0xe53   :  { %v750_v10 = vpop.eup %749 }
 0xe54   :  { %v510_v11 = vmul.f32 %v750_v10, %v508_v9  ;;  %vm515_vm12 = vweird.f32 %v750_v10 }
 0xe55   :  { %vm516_vm14 = vmor %vm514_vm13, %vm515_vm12 }
 0xe56   :  { %v511_v12 = vsub.f32 1.0, %v510_v11  ;;  %v472_v11 = vrot.slane %v876_v60, 3 }
 0xe58   :  { %v512_v13 = vmul.f32 %v750_v10, %v511_v12  ;;  %v475_v12 = vsel %vm112_vm2, %v876_v60, %v472_v11 }
 0xe5a   :  { %v513_v14 = vadd.f32 %v750_v10, %v512_v13 }
 0xe5c   :  { %v517_v17 = vsel %vm516_vm14, %v750_v10, %v513_v14  ;;  %v259_v10 = vsel %vm112_vm2, %v843_v30, %v256_v28 }
 0xe5d   :  { %v522_v20 = vsel %vm519_vm15, %v521_v18, %v517_v17 }
 0xe5e   :  { %v525_v22 = vmul.f32 %v522_v20, %v463_v56 }
 0xebb   :  { %v528_v19 = vpop.permute.xlu1 %527 }
 0xebc   :  { %v530_v21 = vmul.f32 %v528_v19, %v522_v20 }
 0xebe   :  { %532 = vrot.lane.b32.xlu2 %v530_v21, %s762_s30 }
 0xf18   :  { %v533_v23 = vpop.permute.xlu2 %532 }
 0xf19   :  { %v886_v24 = vadd.f32 %v533_v23, %v525_v22 }
 0xf1b   :  { %751 = vtanh.f32 %v886_v24 }
 0xf21   :  { %v752_v25 = vpop.eup %751 }
 0xf22   :  { %538 = vrot.lane.b32.xlu0 %v752_v25, %s761_s29 }
 0xf94   :  { %v539_v26 = vpop.permute.xlu0 %538 }
 0xf95   :  { %v541_v27 = vmul.f32 %v539_v26, %v522_v20 }
 0xf97   :  { %v542_v29 = vpack.c.bf16 %v541_v27, %v541_v27 }
 0xf99   :  { %v556_v31 = vunpack.c.l.b16 %v542_v29  ;;  %v544_v44 = vrot.slane %v542_v29, 3 }
 0xf9b   :  { %v557_v32 = vpack.c.b16 %v556_v31, %v556_v31  ;;  %v547_v45 = vsel %vm112_vm2, %v542_v29, %v544_v44 }
 0xf9d   :  { %558 = vrot.lane.b32.xlu1 %v557_v32, %s762_s30 }
0x100f   :  { %v559_v33 = vpop.permute.xlu1 %558 }
0x1010   :  { %689 = vmatmul.msk.bf16.vlgmr.msrb.gmra.mxu3 %vm50_vm1, %v559_v33 }
0x1093   :  { %v572_v36 = vpop.f32.mrf.mxu3 }
0x1094   :  { %v576_v37 = vadd.f32 %v688_v35, %v572_v36 }
0x1096   :  { %753 = vtanh.f32 %v576_v37  ;;  %v690_v46 = vmul.f32 -1.442695, %v576_v37 }
0x1098   :  { %755 = vpow2.f32 %v690_v46 }
0x109b   :  { %v574_v38 = vpop.f32.mrf.mxu3 }
0x109c   :  { %v754_v39 = vpop.eup %753 }
0x109d   :  { %599 = vrot.lane.b32.xlu2 %v754_v39, %s761_s29 }
0x109e   :  { %v756_v47 = vpop.eup %755 }
0x109f   :  { %v580_v48 = vadd.f32 1.0, %v756_v47 }
0x10a1   :  { %757 = vrcp.f32 %v580_v48  ;;  %v592_v53 = vand.u32 2147483648, %v580_v48  ;;  %vm586_vm3 = vweird.f32 %v580_v48  ;;  %v590_v61 = vand.u32 2147483647, %v580_v48 }
0x10a3   :  { %v593_v55 = vor.u32 1.1754944e-38, %v592_v53  ;;  %vm591_vm5 = vcmp.eq.f32.partialorder %v590_v61, 8.507059e+37 }
0x10a5   :  { %117 = vrot.lane.b32.xlu2 %v115_v41, %s762_s30 }
0x10a7   :  { %v758_v34 = vpop.eup %757 }
0x10a8   :  { %v582_v49 = vmul.f32 %v758_v34, %v580_v48  ;;  %vm587_vm1 = vweird.f32 %v758_v34 }
0x10a9   :  { %vm588_vm4 = vmor %vm586_vm3, %vm587_vm1 }
0x10aa   :  { %v583_v50 = vsub.f32 1.0, %v582_v49 }
0x10ac   :  { %v584_v51 = vmul.f32 %v758_v34, %v583_v50 }
0x10ad   :  { %333 = vrot.lane.b32.xlu2 %v331_v43, %s762_s30 }
0x10ae   :  { %v585_v52 = vadd.f32 %v758_v34, %v584_v51 }
0x10b0   :  { %v589_v54 = vsel %vm588_vm4, %v758_v34, %v585_v52 }
0x10b1   :  { %v594_v57 = vsel %vm591_vm5, %v593_v55, %v589_v54 }
0x10b2   :  { %v597_v0 = vmul.f32 %v594_v57, %v886_v24 }
0x10b5   :  { %549 = vrot.lane.b32.xlu2 %v547_v45, %s762_s30 }
0x10f7   :  { %v600_v56 = vpop.permute.xlu2 %599 }
0x10f8   :  { %v602_v58 = vmul.f32 %v600_v56, %v594_v57 }
0x10fa   :  { %604 = vrot.lane.b32.xlu0 %v602_v58, %s762_s30 }
0x10ff   :  { %v118_v62 = vpop.permute.xlu2 %117 }
0x1100   :  { %121 = vst.msk [vmem:[%s974_s4] sm:$0x1] %vm120_vm6, %v118_v62 }
0x1102   :  { %189 = vrot.lane.b32.xlu0 %v187_v63, %s762_s30 }
0x1107   :  { %v334_v2 = vpop.permute.xlu2 %333 }
0x1108   :  { %675 = vst.msk [vmem:[%s974_s4 + $0x3] sm:$0x1] %vm120_vm6, %v334_v2 }
0x110a   :  { %405 = vrot.lane.b32.xlu0 %v403_v3, %s762_s30 }
0x110f   :  { %v550_v4 = vpop.permute.xlu2 %549 }
0x1110   :  { %687 = vst.msk [vmem:[%s974_s4 + $0x6] sm:$0x1] %vm120_vm6, %v550_v4 }
0x116c   :  { %v605_v5 = vpop.permute.xlu0 %604 }
0x116d   :  { %v607_v6 = vadd.f32 %v605_v5, %v597_v0 }
0x116f   :  { %759 = vtanh.f32 %v607_v6  ;;  %633 = vrot.lane.b32.xlu2 %v607_v6, %s763_s25 }
0x1174   :  { %v190_v7 = vpop.permute.xlu0 %189 }
0x1175   :  { %v760_v8 = vpop.eup %759  ;;  %667 = vst.msk [vmem:[%s974_s4 + $0x1] sm:$0x1] %vm120_vm6, %v190_v7 }
0x1176   :  { %610 = vrot.lane.b32.xlu1 %v760_v8, %s761_s29 }
0x117c   :  { %v406_v9 = vpop.permute.xlu0 %405 }
0x117d   :  { %679 = vst.msk [vmem:[%s974_s4 + $0x4] sm:$0x1] %vm120_vm6, %v406_v9 }
0x117e   :  { %261 = vrot.lane.b32.xlu1 %v259_v10, %s762_s30 }
0x1186   :  { %477 = vrot.lane.b32.xlu1 %v475_v12, %s762_s30 }
0x11c9   :  { %v634_v13 = vpop.permute.xlu2 %633 }
0x11ca   :  { %636 = vst.msk [vmem:[#allocation3] sm:$0x3] %vm26_vm0, %v634_v13 }
0x11cb   :  { %641 = vst.msk [vmem:[%s975_s6] sm:$0x3] %vm26_vm0, %v634_v13 }
0x11e8   :  { %v611_v14 = vpop.permute.xlu1 %610 }
0x11e9   :  { %v613_v15 = vmul.f32 %v611_v14, %v594_v57 }
0x11eb   :  { %v614_v30 = vpack.c.bf16 %v613_v15, %v613_v15  ;;  %627 = vrot.lane.b32.xlu1 %v613_v15, %s762_s30 }
0x11ed   :  { %v616_v16 = vrot.slane %v614_v30, 3 }
0x11ef   :  { %v619_v17 = vsel %vm112_vm2, %v614_v30, %v616_v16 }
0x11f0   :  { %621 = vrot.lane.b32.xlu0 %v619_v17, %s762_s30  ;;  %v262_v60 = vpop.permute.xlu1 %261 }
0x11f1   :  { %671 = vst.msk [vmem:[%s974_s4 + $0x2] sm:$0x1] %vm120_vm6, %v262_v60 }
0x11f8   :  { %v478_v18 = vpop.permute.xlu1 %477 }
0x11f9   :  { %683 = vst.msk [vmem:[%s974_s4 + $0x5] sm:$0x1] %vm120_vm6, %v478_v18 }
0x125d   :  { %v628_v19 = vpop.permute.xlu1 %627 }
0x125e   :  { %631 = vst.msk [vmem:[#allocation2] sm:$0x3] %vm26_vm0, %v628_v19 }
0x125f   :  { %640 = vst.msk [vmem:[%s976_s5] sm:$0x3] %vm26_vm0, %v628_v19 }
0x1262   :  { %v622_v20 = vpop.permute.xlu0 %621 }
0x1263   :  { %691 = vst.msk [vmem:[%s974_s4 + $0x7] sm:$0x1] %vm120_vm6, %v622_v20 }

</bundles_post_ra>
